<compile_context>
chip_gen: v7x
topology: tpu7x:2x2x1
jax: 0.10.0
libtpu: 0.0.40
codegen_flags: <defaults>
</compile_context>

<pallas_src>
import jax
import jax.numpy as jnp
from jax.experimental import pallas as pl
from jax.experimental.pallas import tpu as pltpu

LN_EPS = 1e-5          # torch.nn.LayerNorm default


def _lane_group_sum(h):
    """Pre-reduce 128-lane groups with VPU adds, then one XLU cross-lane reduce."""
    d = h.shape[-1]
    acc = h[:, 0:128]
    for off in range(128, d, 128):
        acc = acc + h[:, off:off + 128]
    return jnp.sum(acc, axis=-1, keepdims=True)


def _layer_norm(h, gamma, beta):
    """Single-pass LN: sum and sum-of-squares issued back-to-back, all f32."""
    d = h.shape[-1]
    s = _lane_group_sum(h)
    ss = _lane_group_sum(h * h)
    mu = s * (1.0 / d)
    var = jnp.maximum(ss * (1.0 / d) - mu * mu, 0.0)
    return (h - mu) * jax.lax.rsqrt(var + LN_EPS) * gamma + beta


def _mlp_kernel(x_ref, w1_ref, w2_ref, w3_ref, w4_ref, w5_ref, vec_ref, o_ref):
    f32, bf16 = jnp.float32, jnp.bfloat16

    # Packed [16, 512] f32 slab of per-layer vectors (bias, LN gamma, LN beta).
    b1, g1, be1 = vec_ref[0:1, :], vec_ref[1:2, :], vec_ref[2:3, :]
    b2, g2, be2 = vec_ref[3:4, :], vec_ref[4:5, :], vec_ref[5:6, :]
    b3, g3, be3 = vec_ref[6:7, 0:256], vec_ref[7:8, 0:256], vec_ref[8:9, 0:256]
    b4 = vec_ref[9:10, 0:128]
    b5 = vec_ref[10:11, 0:128]

    x = x_ref[...].astype(bf16)

    # fc1 -> ln1 -> relu   (dropout is identity in eval mode)
    h1 = jnp.dot(x, w1_ref[...], preferred_element_type=f32) + b1
    x1 = jnp.maximum(_layer_norm(h1, g1, be1), 0.0).astype(bf16)     # stored bf16

    # fc2 -> ln2 -> relu
    h2 = jnp.dot(x1, w2_ref[...], preferred_element_type=f32) + b2
    x2 = jnp.maximum(_layer_norm(h2, g2, be2), 0.0)                  # f32 transient

    # residual add in f32 (x1 promotes), stored bf16
    xs = (x1 + x2).astype(bf16)

    # fc3 -> ln3 -> relu
    h3 = jnp.dot(xs, w3_ref[...], preferred_element_type=f32) + b3
    x3 = jnp.maximum(_layer_norm(h3, g3, be3), 0.0).astype(bf16)

    # fc4 -> relu (relu in f32, store bf16)
    h4 = jnp.dot(x3, w4_ref[...], preferred_element_type=f32) + b4
    x4 = jnp.maximum(h4, 0.0).astype(bf16)

    # fc5 (Q-values head), lane-dense 128-wide bf16 output (cols 4..127 zero pad)
    o = jnp.dot(x4, w5_ref[...], preferred_element_type=f32) + b5
    o_ref[...] = o.astype(o_ref.dtype)


def _pick_batch_tile(b):
    if b <= 16:
        return 16       # bf16 sublane minimum; single-vreg output tile
    if b <= 32:
        return 32
    return 128          # streams M through the MXU; >=2 tiles shard v7x cores


@jax.jit
def loaded_nn_agent_forward(x, packed):
    """x: [B, 16] (or [16]) float32. packed: kernel-layout params. -> [B, 4] f32."""
    if x.ndim == 1:
        x = x[None, :]
    B = x.shape[0]
    tile = _pick_batch_tile(B)
    padded_B = ((B + tile - 1) // tile) * tile
    if padded_B != B:
        x = jnp.pad(x, ((0, padded_B - B), (0, 0)))
    num_tiles = padded_B // tile

    w1, w2, w3, w4, w5 = (packed["w1"], packed["w2"], packed["w3"],
                          packed["w4"], packed["w5"])
    vecs = packed["vecs"]

    const = lambda shape: pl.BlockSpec(shape, lambda i: (0, 0))
    out_padded = pl.pallas_call(
        _mlp_kernel,
        out_shape=jax.ShapeDtypeStruct((padded_B, 128), jnp.bfloat16),
        grid_spec=pltpu.PrefetchScalarGridSpec(
            num_scalar_prefetch=0,
            grid=(num_tiles,),
            in_specs=[
                pl.BlockSpec((tile, 16), lambda i: (i, 0)),          # x tile
                const(w1.shape), const(w2.shape), const(w3.shape),   # weights
                const(w4.shape), const(w5.shape),
                const(vecs.shape),                                   # bias/LN slab
            ],
            out_specs=pl.BlockSpec((tile, 128), lambda i: (i, 0)),
        ),
        compiler_params=pltpu.CompilerParams(
            dimension_semantics=("parallel",),
            vmem_limit_bytes=32 * 1024 * 1024,
        ),
    )(x, w1, w2, w3, w4, w5, vecs)

    return out_padded[:B, :4].astype(jnp.float32)


def init_params(key):
    """Torch-layout f32 params (weights already [in, out]; torch default init)."""
    dims = [(16, 512), (512, 512), (512, 256), (256, 128), (128, 4)]
    params = {}
    keys = jax.random.split(key, 2 * len(dims))
    for i, (din, dout) in enumerate(dims):
        bound = 1.0 / (din ** 0.5)
        params[f"w{i+1}"] = jax.random.uniform(
            keys[2 * i], (din, dout), jnp.float32, -bound, bound)
        params[f"b{i+1}"] = jax.random.uniform(
            keys[2 * i + 1], (1, dout), jnp.float32, -bound, bound)
    for i, d in zip((1, 2, 3), (512, 512, 256)):
        params[f"g{i}"] = jnp.ones((1, d), jnp.float32)
        params[f"be{i}"] = jnp.zeros((1, d), jnp.float32)
    return params


def pack_params(p):
    """Torch-layout f32 params -> kernel layout: bf16 weights, W5/b5 zero-padded
    to 128 lanes, all small vectors packed into a single [16, 512] f32 slab."""
    vecs = jnp.zeros((16, 512), jnp.float32)
    vecs = vecs.at[0, :512].set(p["b1"][0])
    vecs = vecs.at[1, :512].set(p["g1"][0])
    vecs = vecs.at[2, :512].set(p["be1"][0])
    vecs = vecs.at[3, :512].set(p["b2"][0])
    vecs = vecs.at[4, :512].set(p["g2"][0])
    vecs = vecs.at[5, :512].set(p["be2"][0])
    vecs = vecs.at[6, :256].set(p["b3"][0])
    vecs = vecs.at[7, :256].set(p["g3"][0])
    vecs = vecs.at[8, :256].set(p["be3"][0])
    vecs = vecs.at[9, :128].set(p["b4"][0])
    vecs = vecs.at[10, :4].set(p["b5"][0])
    w5_pad = jnp.zeros((128, 128), jnp.float32).at[:, :4].set(p["w5"])
    return {
        "w1": p["w1"].astype(jnp.bfloat16),
        "w2": p["w2"].astype(jnp.bfloat16),
        "w3": p["w3"].astype(jnp.bfloat16),
        "w4": p["w4"].astype(jnp.bfloat16),
        "w5": w5_pad.astype(jnp.bfloat16),
        "vecs": vecs,
    }


def _ref_forward(x, p):
    """Pure-JAX reference with the same bf16 operand rounding as the kernel."""
    hp = jax.lax.Precision.HIGHEST

    def mm(a, w):
        a = a.astype(jnp.bfloat16).astype(jnp.float32)
        w = w.astype(jnp.bfloat16).astype(jnp.float32)
        return jnp.dot(a, w, precision=hp)

    def ln(h, g, b):
        mu = jnp.mean(h, axis=-1, keepdims=True)
        var = jnp.mean((h - mu) ** 2, axis=-1, keepdims=True)
        return (h - mu) * jax.lax.rsqrt(var + LN_EPS) * g + b

    x1 = jnp.maximum(ln(mm(x, p["w1"]) + p["b1"], p["g1"], p["be1"]), 0.0)
    x2 = jnp.maximum(ln(mm(x1, p["w2"]) + p["b2"], p["g2"], p["be2"]), 0.0)
    xs = x1 + x2
    x3 = jnp.maximum(ln(mm(xs, p["w3"]) + p["b3"], p["g3"], p["be3"]), 0.0)
    x4 = jnp.maximum(mm(x3, p["w4"]) + p["b4"], 0.0)
    return mm(x4, p["w5"]) + p["b5"]


if __name__ == "__main__":
    key = jax.random.PRNGKey(0)
    pkey, xkey = jax.random.split(key)
    raw_params = init_params(pkey)
    packed_params = pack_params(raw_params)

    # Batch of 8 flattened 4x4 boards (16 features), scaled like get_action does.
    B = 8
    board = jax.random.randint(xkey, (B, 16), 0, 2048).astype(jnp.float32)
    x = board / 2048.0

    q_values = loaded_nn_agent_forward(x, packed_params)
    jax.block_until_ready(q_values)

    assert q_values.shape == (B, 4) and q_values.dtype == jnp.float32
    assert bool(jnp.all(jnp.isfinite(q_values)))

    q_ref = _ref_forward(x, raw_params)
    max_err = float(jnp.max(jnp.abs(q_values - q_ref)))
    assert jnp.allclose(q_values, q_ref, atol=2e-2, rtol=2e-2), max_err

    print("KERNEL_OK")
</pallas_src>

<mosaic_0001>
module attributes {stable_mosaic.version = 11 : i64} {
  func.func @_mlp_kernel(%arg0: i32, %arg1: memref<16x16xf32, #tpu.memory_space<vmem>>, %arg2: memref<16x512xbf16, #tpu.memory_space<vmem>>, %arg3: memref<512x512xbf16, #tpu.memory_space<vmem>>, %arg4: memref<512x256xbf16, #tpu.memory_space<vmem>>, %arg5: memref<256x128xbf16, #tpu.memory_space<vmem>>, %arg6: memref<128x128xbf16, #tpu.memory_space<vmem>>, %arg7: memref<16x512xf32, #tpu.memory_space<vmem>>, %arg8: memref<16x128xbf16, #tpu.memory_space<vmem>>) attributes {dimension_semantics = [#tpu.dimension_semantics<parallel>], iteration_bounds = array<i64: 1>, scalar_prefetch = 0 : i64, scratch_operands = 0 : i64, tpu.core_type = #tpu.core_type<tc>, window_params = [{transform_indices = @transform_0, window_bounds = array<i64: 16, 16>}, {pipeline_mode = #tpu.pipeline_mode<synchronous>, transform_indices = @transform_1, window_bounds = array<i64: 16, 512>}, {pipeline_mode = #tpu.pipeline_mode<synchronous>, transform_indices = @transform_2, window_bounds = array<i64: 512, 512>}, {pipeline_mode = #tpu.pipeline_mode<synchronous>, transform_indices = @transform_3, window_bounds = array<i64: 512, 256>}, {pipeline_mode = #tpu.pipeline_mode<synchronous>, transform_indices = @transform_4, window_bounds = array<i64: 256, 128>}, {pipeline_mode = #tpu.pipeline_mode<synchronous>, transform_indices = @transform_5, window_bounds = array<i64: 128, 128>}, {pipeline_mode = #tpu.pipeline_mode<synchronous>, transform_indices = @transform_6, window_bounds = array<i64: 16, 512>}, {transform_indices = @transform_7, window_bounds = array<i64: 16, 128>}]} {
    %c0 = arith.constant 0 : index
    %c0_0 = arith.constant 0 : index
    %0 = vector.load %arg7[%c0, %c0_0] : memref<16x512xf32, #tpu.memory_space<vmem>>, vector<1x512xf32>
    %c1 = arith.constant 1 : index
    %c0_1 = arith.constant 0 : index
    %1 = vector.load %arg7[%c1, %c0_1] : memref<16x512xf32, #tpu.memory_space<vmem>>, vector<1x512xf32>
    %c2 = arith.constant 2 : index
    %c0_2 = arith.constant 0 : index
    %2 = vector.load %arg7[%c2, %c0_2] : memref<16x512xf32, #tpu.memory_space<vmem>>, vector<1x512xf32>
    %c3 = arith.constant 3 : index
    %c0_3 = arith.constant 0 : index
    %3 = vector.load %arg7[%c3, %c0_3] : memref<16x512xf32, #tpu.memory_space<vmem>>, vector<1x512xf32>
    %c4 = arith.constant 4 : index
    %c0_4 = arith.constant 0 : index
    %4 = vector.load %arg7[%c4, %c0_4] : memref<16x512xf32, #tpu.memory_space<vmem>>, vector<1x512xf32>
    %c5 = arith.constant 5 : index
    %c0_5 = arith.constant 0 : index
    %5 = vector.load %arg7[%c5, %c0_5] : memref<16x512xf32, #tpu.memory_space<vmem>>, vector<1x512xf32>
    %c6 = arith.constant 6 : index
    %c0_6 = arith.constant 0 : index
    %6 = vector.load %arg7[%c6, %c0_6] : memref<16x512xf32, #tpu.memory_space<vmem>>, vector<1x256xf32>
    %c7 = arith.constant 7 : index
    %c0_7 = arith.constant 0 : index
    %7 = vector.load %arg7[%c7, %c0_7] : memref<16x512xf32, #tpu.memory_space<vmem>>, vector<1x256xf32>
    %c8 = arith.constant 8 : index
    %c0_8 = arith.constant 0 : index
    %8 = vector.load %arg7[%c8, %c0_8] : memref<16x512xf32, #tpu.memory_space<vmem>>, vector<1x256xf32>
    %c9 = arith.constant 9 : index
    %c0_9 = arith.constant 0 : index
    %9 = vector.load %arg7[%c9, %c0_9] : memref<16x512xf32, #tpu.memory_space<vmem>>, vector<1x128xf32>
    %c10 = arith.constant 10 : index
    %c0_10 = arith.constant 0 : index
    %10 = vector.load %arg7[%c10, %c0_10] : memref<16x512xf32, #tpu.memory_space<vmem>>, vector<1x128xf32>
    %c0_11 = arith.constant 0 : index
    %c0_12 = arith.constant 0 : index
    %11 = vector.load %arg1[%c0_11, %c0_12] : memref<16x16xf32, #tpu.memory_space<vmem>>, vector<16x16xf32>
    %12 = arith.truncf %11 : vector<16x16xf32> to vector<16x16xbf16>
    %c0_13 = arith.constant 0 : index
    %c0_14 = arith.constant 0 : index
    %13 = vector.load %arg2[%c0_13, %c0_14] : memref<16x512xbf16, #tpu.memory_space<vmem>>, vector<16x512xbf16>
    %cst = arith.constant dense<0.000000e+00> : vector<16x512xf32>
    %14 = tpu.matmul %12, %13, %cst {dimension_numbers = #tpu.dot_dimension_numbers<[1], [0], [0], [1], [0, 0, 1, 1], [], []>} : vector<16x16xbf16>, vector<16x512xbf16>, vector<16x512xf32> -> vector<16x512xf32>
    %15 = vector.broadcast %0 : vector<1x512xf32> to vector<16x512xf32>
    %16 = arith.addf %14, %15 : vector<16x512xf32>
    %17 = vector.extract_strided_slice %16 {offsets = [0, 0], sizes = [16, 128], strides = [1, 1]} : vector<16x512xf32> to vector<16x128xf32>
    %18 = vector.extract_strided_slice %16 {offsets = [0, 128], sizes = [16, 128], strides = [1, 1]} : vector<16x512xf32> to vector<16x128xf32>
    %19 = arith.addf %17, %18 : vector<16x128xf32>
    %20 = vector.extract_strided_slice %16 {offsets = [0, 256], sizes = [16, 128], strides = [1, 1]} : vector<16x512xf32> to vector<16x128xf32>
    %21 = arith.addf %19, %20 : vector<16x128xf32>
    %22 = vector.extract_strided_slice %16 {offsets = [0, 384], sizes = [16, 128], strides = [1, 1]} : vector<16x512xf32> to vector<16x128xf32>
    %23 = arith.addf %21, %22 : vector<16x128xf32>
    %cst_15 = arith.constant dense<0.000000e+00> : vector<16xf32>
    %24 = vector.multi_reduction <add>, %23, %cst_15 [1] : vector<16x128xf32> to vector<16xf32>
    %25 = vector.shape_cast %24 : vector<16xf32> to vector<16x1xf32>
    %26 = arith.mulf %16, %16 : vector<16x512xf32>
    %27 = vector.extract_strided_slice %26 {offsets = [0, 0], sizes = [16, 128], strides = [1, 1]} : vector<16x512xf32> to vector<16x128xf32>
    %28 = vector.extract_strided_slice %26 {offsets = [0, 128], sizes = [16, 128], strides = [1, 1]} : vector<16x512xf32> to vector<16x128xf32>
    %29 = arith.addf %27, %28 : vector<16x128xf32>
    %30 = vector.extract_strided_slice %26 {offsets = [0, 256], sizes = [16, 128], strides = [1, 1]} : vector<16x512xf32> to vector<16x128xf32>
    %31 = arith.addf %29, %30 : vector<16x128xf32>
    %32 = vector.extract_strided_slice %26 {offsets = [0, 384], sizes = [16, 128], strides = [1, 1]} : vector<16x512xf32> to vector<16x128xf32>
    %33 = arith.addf %31, %32 : vector<16x128xf32>
    %cst_16 = arith.constant dense<0.000000e+00> : vector<16xf32>
    %34 = vector.multi_reduction <add>, %33, %cst_16 [1] : vector<16x128xf32> to vector<16xf32>
    %35 = vector.shape_cast %34 : vector<16xf32> to vector<16x1xf32>
    %cst_17 = arith.constant 0.001953125 : f32
    %36 = vector.broadcast %cst_17 : f32 to vector<16x1xf32>
    %37 = arith.mulf %25, %36 : vector<16x1xf32>
    %cst_18 = arith.constant 0.001953125 : f32
    %38 = vector.broadcast %cst_18 : f32 to vector<16x1xf32>
    %39 = arith.mulf %35, %38 : vector<16x1xf32>
    %40 = arith.mulf %37, %37 : vector<16x1xf32>
    %41 = arith.subf %39, %40 : vector<16x1xf32>
    %cst_19 = arith.constant 0.000000e+00 : f32
    %42 = vector.broadcast %cst_19 : f32 to vector<16x1xf32>
    %43 = arith.maximumf %41, %42 : vector<16x1xf32>
    %44 = vector.broadcast %37 : vector<16x1xf32> to vector<16x512xf32>
    %45 = arith.subf %16, %44 : vector<16x512xf32>
    %cst_20 = arith.constant 9.99999974E-6 : f32
    %46 = vector.broadcast %cst_20 : f32 to vector<16x1xf32>
    %47 = arith.addf %43, %46 : vector<16x1xf32>
    %48 = math.rsqrt %47 : vector<16x1xf32>
    %49 = vector.broadcast %48 : vector<16x1xf32> to vector<16x512xf32>
    %50 = arith.mulf %45, %49 : vector<16x512xf32>
    %51 = vector.broadcast %1 : vector<1x512xf32> to vector<16x512xf32>
    %52 = arith.mulf %50, %51 : vector<16x512xf32>
    %53 = vector.broadcast %2 : vector<1x512xf32> to vector<16x512xf32>
    %54 = arith.addf %52, %53 : vector<16x512xf32>
    %cst_21 = arith.constant 0.000000e+00 : f32
    %55 = vector.broadcast %cst_21 : f32 to vector<16x512xf32>
    %56 = arith.maximumf %54, %55 : vector<16x512xf32>
    %57 = arith.truncf %56 : vector<16x512xf32> to vector<16x512xbf16>
    %c0_22 = arith.constant 0 : index
    %c0_23 = arith.constant 0 : index
    %58 = vector.load %arg3[%c0_22, %c0_23] : memref<512x512xbf16, #tpu.memory_space<vmem>>, vector<512x512xbf16>
    %cst_24 = arith.constant dense<0.000000e+00> : vector<16x512xf32>
    %59 = tpu.matmul %57, %58, %cst_24 {dimension_numbers = #tpu.dot_dimension_numbers<[1], [0], [0], [1], [0, 0, 1, 1], [], []>} : vector<16x512xbf16>, vector<512x512xbf16>, vector<16x512xf32> -> vector<16x512xf32>
    %60 = vector.broadcast %3 : vector<1x512xf32> to vector<16x512xf32>
    %61 = arith.addf %59, %60 : vector<16x512xf32>
    %62 = vector.extract_strided_slice %61 {offsets = [0, 0], sizes = [16, 128], strides = [1, 1]} : vector<16x512xf32> to vector<16x128xf32>
    %63 = vector.extract_strided_slice %61 {offsets = [0, 128], sizes = [16, 128], strides = [1, 1]} : vector<16x512xf32> to vector<16x128xf32>
    %64 = arith.addf %62, %63 : vector<16x128xf32>
    %65 = vector.extract_strided_slice %61 {offsets = [0, 256], sizes = [16, 128], strides = [1, 1]} : vector<16x512xf32> to vector<16x128xf32>
    %66 = arith.addf %64, %65 : vector<16x128xf32>
    %67 = vector.extract_strided_slice %61 {offsets = [0, 384], sizes = [16, 128], strides = [1, 1]} : vector<16x512xf32> to vector<16x128xf32>
    %68 = arith.addf %66, %67 : vector<16x128xf32>
    %cst_25 = arith.constant dense<0.000000e+00> : vector<16xf32>
    %69 = vector.multi_reduction <add>, %68, %cst_25 [1] : vector<16x128xf32> to vector<16xf32>
    %70 = vector.shape_cast %69 : vector<16xf32> to vector<16x1xf32>
    %71 = arith.mulf %61, %61 : vector<16x512xf32>
    %72 = vector.extract_strided_slice %71 {offsets = [0, 0], sizes = [16, 128], strides = [1, 1]} : vector<16x512xf32> to vector<16x128xf32>
    %73 = vector.extract_strided_slice %71 {offsets = [0, 128], sizes = [16, 128], strides = [1, 1]} : vector<16x512xf32> to vector<16x128xf32>
    %74 = arith.addf %72, %73 : vector<16x128xf32>
    %75 = vector.extract_strided_slice %71 {offsets = [0, 256], sizes = [16, 128], strides = [1, 1]} : vector<16x512xf32> to vector<16x128xf32>
    %76 = arith.addf %74, %75 : vector<16x128xf32>
    %77 = vector.extract_strided_slice %71 {offsets = [0, 384], sizes = [16, 128], strides = [1, 1]} : vector<16x512xf32> to vector<16x128xf32>
    %78 = arith.addf %76, %77 : vector<16x128xf32>
    %cst_26 = arith.constant dense<0.000000e+00> : vector<16xf32>
    %79 = vector.multi_reduction <add>, %78, %cst_26 [1] : vector<16x128xf32> to vector<16xf32>
    %80 = vector.shape_cast %79 : vector<16xf32> to vector<16x1xf32>
    %cst_27 = arith.constant 0.001953125 : f32
    %81 = vector.broadcast %cst_27 : f32 to vector<16x1xf32>
    %82 = arith.mulf %70, %81 : vector<16x1xf32>
    %cst_28 = arith.constant 0.001953125 : f32
    %83 = vector.broadcast %cst_28 : f32 to vector<16x1xf32>
    %84 = arith.mulf %80, %83 : vector<16x1xf32>
    %85 = arith.mulf %82, %82 : vector<16x1xf32>
    %86 = arith.subf %84, %85 : vector<16x1xf32>
    %cst_29 = arith.constant 0.000000e+00 : f32
    %87 = vector.broadcast %cst_29 : f32 to vector<16x1xf32>
    %88 = arith.maximumf %86, %87 : vector<16x1xf32>
    %89 = vector.broadcast %82 : vector<16x1xf32> to vector<16x512xf32>
    %90 = arith.subf %61, %89 : vector<16x512xf32>
    %cst_30 = arith.constant 9.99999974E-6 : f32
    %91 = vector.broadcast %cst_30 : f32 to vector<16x1xf32>
    %92 = arith.addf %88, %91 : vector<16x1xf32>
    %93 = math.rsqrt %92 : vector<16x1xf32>
    %94 = vector.broadcast %93 : vector<16x1xf32> to vector<16x512xf32>
    %95 = arith.mulf %90, %94 : vector<16x512xf32>
    %96 = vector.broadcast %4 : vector<1x512xf32> to vector<16x512xf32>
    %97 = arith.mulf %95, %96 : vector<16x512xf32>
    %98 = vector.broadcast %5 : vector<1x512xf32> to vector<16x512xf32>
    %99 = arith.addf %97, %98 : vector<16x512xf32>
    %cst_31 = arith.constant 0.000000e+00 : f32
    %100 = vector.broadcast %cst_31 : f32 to vector<16x512xf32>
    %101 = arith.maximumf %99, %100 : vector<16x512xf32>
    %102 = arith.extf %57 : vector<16x512xbf16> to vector<16x512xf32>
    %103 = arith.addf %102, %101 : vector<16x512xf32>
    %104 = arith.truncf %103 : vector<16x512xf32> to vector<16x512xbf16>
    %c0_32 = arith.constant 0 : index
    %c0_33 = arith.constant 0 : index
    %105 = vector.load %arg4[%c0_32, %c0_33] : memref<512x256xbf16, #tpu.memory_space<vmem>>, vector<512x256xbf16>
    %cst_34 = arith.constant dense<0.000000e+00> : vector<16x256xf32>
    %106 = tpu.matmul %104, %105, %cst_34 {dimension_numbers = #tpu.dot_dimension_numbers<[1], [0], [0], [1], [0, 0, 1, 1], [], []>} : vector<16x512xbf16>, vector<512x256xbf16>, vector<16x256xf32> -> vector<16x256xf32>
    %107 = vector.broadcast %6 : vector<1x256xf32> to vector<16x256xf32>
    %108 = arith.addf %106, %107 : vector<16x256xf32>
    %109 = vector.extract_strided_slice %108 {offsets = [0, 0], sizes = [16, 128], strides = [1, 1]} : vector<16x256xf32> to vector<16x128xf32>
    %110 = vector.extract_strided_slice %108 {offsets = [0, 128], sizes = [16, 128], strides = [1, 1]} : vector<16x256xf32> to vector<16x128xf32>
    %111 = arith.addf %109, %110 : vector<16x128xf32>
    %cst_35 = arith.constant dense<0.000000e+00> : vector<16xf32>
    %112 = vector.multi_reduction <add>, %111, %cst_35 [1] : vector<16x128xf32> to vector<16xf32>
    %113 = vector.shape_cast %112 : vector<16xf32> to vector<16x1xf32>
    %114 = arith.mulf %108, %108 : vector<16x256xf32>
    %115 = vector.extract_strided_slice %114 {offsets = [0, 0], sizes = [16, 128], strides = [1, 1]} : vector<16x256xf32> to vector<16x128xf32>
    %116 = vector.extract_strided_slice %114 {offsets = [0, 128], sizes = [16, 128], strides = [1, 1]} : vector<16x256xf32> to vector<16x128xf32>
    %117 = arith.addf %115, %116 : vector<16x128xf32>
    %cst_36 = arith.constant dense<0.000000e+00> : vector<16xf32>
    %118 = vector.multi_reduction <add>, %117, %cst_36 [1] : vector<16x128xf32> to vector<16xf32>
    %119 = vector.shape_cast %118 : vector<16xf32> to vector<16x1xf32>
    %cst_37 = arith.constant 3.906250e-03 : f32
    %120 = vector.broadcast %cst_37 : f32 to vector<16x1xf32>
    %121 = arith.mulf %113, %120 : vector<16x1xf32>
    %cst_38 = arith.constant 3.906250e-03 : f32
    %122 = vector.broadcast %cst_38 : f32 to vector<16x1xf32>
    %123 = arith.mulf %119, %122 : vector<16x1xf32>
    %124 = arith.mulf %121, %121 : vector<16x1xf32>
    %125 = arith.subf %123, %124 : vector<16x1xf32>
    %cst_39 = arith.constant 0.000000e+00 : f32
    %126 = vector.broadcast %cst_39 : f32 to vector<16x1xf32>
    %127 = arith.maximumf %125, %126 : vector<16x1xf32>
    %128 = vector.broadcast %121 : vector<16x1xf32> to vector<16x256xf32>
    %129 = arith.subf %108, %128 : vector<16x256xf32>
    %cst_40 = arith.constant 9.99999974E-6 : f32
    %130 = vector.broadcast %cst_40 : f32 to vector<16x1xf32>
    %131 = arith.addf %127, %130 : vector<16x1xf32>
    %132 = math.rsqrt %131 : vector<16x1xf32>
    %133 = vector.broadcast %132 : vector<16x1xf32> to vector<16x256xf32>
    %134 = arith.mulf %129, %133 : vector<16x256xf32>
    %135 = vector.broadcast %7 : vector<1x256xf32> to vector<16x256xf32>
    %136 = arith.mulf %134, %135 : vector<16x256xf32>
    %137 = vector.broadcast %8 : vector<1x256xf32> to vector<16x256xf32>
    %138 = arith.addf %136, %137 : vector<16x256xf32>
    %cst_41 = arith.constant 0.000000e+00 : f32
    %139 = vector.broadcast %cst_41 : f32 to vector<16x256xf32>
    %140 = arith.maximumf %138, %139 : vector<16x256xf32>
    %141 = arith.truncf %140 : vector<16x256xf32> to vector<16x256xbf16>
    %c0_42 = arith.constant 0 : index
    %c0_43 = arith.constant 0 : index
    %142 = vector.load %arg5[%c0_42, %c0_43] : memref<256x128xbf16, #tpu.memory_space<vmem>>, vector<256x128xbf16>
    %cst_44 = arith.constant dense<0.000000e+00> : vector<16x128xf32>
    %143 = tpu.matmul %141, %142, %cst_44 {dimension_numbers = #tpu.dot_dimension_numbers<[1], [0], [0], [1], [0, 0, 1, 1], [], []>} : vector<16x256xbf16>, vector<256x128xbf16>, vector<16x128xf32> -> vector<16x128xf32>
    %144 = vector.broadcast %9 : vector<1x128xf32> to vector<16x128xf32>
    %145 = arith.addf %143, %144 : vector<16x128xf32>
    %cst_45 = arith.constant 0.000000e+00 : f32
    %146 = vector.broadcast %cst_45 : f32 to vector<16x128xf32>
    %147 = arith.maximumf %145, %146 : vector<16x128xf32>
    %148 = arith.truncf %147 : vector<16x128xf32> to vector<16x128xbf16>
    %c0_46 = arith.constant 0 : index
    %c0_47 = arith.constant 0 : index
    %149 = vector.load %arg6[%c0_46, %c0_47] : memref<128x128xbf16, #tpu.memory_space<vmem>>, vector<128x128xbf16>
    %cst_48 = arith.constant dense<0.000000e+00> : vector<16x128xf32>
    %150 = tpu.matmul %148, %149, %cst_48 {dimension_numbers = #tpu.dot_dimension_numbers<[1], [0], [0], [1], [0, 0, 1, 1], [], []>} : vector<16x128xbf16>, vector<128x128xbf16>, vector<16x128xf32> -> vector<16x128xf32>
    %151 = vector.broadcast %10 : vector<1x128xf32> to vector<16x128xf32>
    %152 = arith.addf %150, %151 : vector<16x128xf32>
    %153 = arith.truncf %152 : vector<16x128xf32> to vector<16x128xbf16>
    %c0_49 = arith.constant 0 : index
    %c0_50 = arith.constant 0 : index
    %154 = vector.load %arg8[%c0_49, %c0_50] : memref<16x128xbf16, #tpu.memory_space<vmem>>, vector<16x128xbf16>
    tpu.vector_store %arg8[%c0_49, %c0_50], %153 {strides = array<i32>} : memref<16x128xbf16, #tpu.memory_space<vmem>>, vector<16x128xbf16>,
    return
  }
  func.func @transform_0(%arg0: i32) -> (i32, i32) {
    %c0_i32 = arith.constant 0 : i32
    %c0_i32_0 = arith.constant 0 : i32
    return %arg0, %c0_i32 : i32, i32
  }
  func.func @transform_1(%arg0: i32) -> (i32, i32) {
    %c0_i32 = arith.constant 0 : i32
    %c0_i32_0 = arith.constant 0 : i32
    %c0_i32_1 = arith.constant 0 : i32
    return %c0_i32, %c0_i32_0 : i32, i32
  }
  func.func @transform_2(%arg0: i32) -> (i32, i32) {
    %c0_i32 = arith.constant 0 : i32
    %c0_i32_0 = arith.constant 0 : i32
    %c0_i32_1 = arith.constant 0 : i32
    return %c0_i32, %c0_i32_0 : i32, i32
  }
  func.func @transform_3(%arg0: i32) -> (i32, i32) {
    %c0_i32 = arith.constant 0 : i32
    %c0_i32_0 = arith.constant 0 : i32
    %c0_i32_1 = arith.constant 0 : i32
    return %c0_i32, %c0_i32_0 : i32, i32
  }
  func.func @transform_4(%arg0: i32) -> (i32, i32) {
    %c0_i32 = arith.constant 0 : i32
    %c0_i32_0 = arith.constant 0 : i32
    %c0_i32_1 = arith.constant 0 : i32
    return %c0_i32, %c0_i32_0 : i32, i32
  }
  func.func @transform_5(%arg0: i32) -> (i32, i32) {
    %c0_i32 = arith.constant 0 : i32
    %c0_i32_0 = arith.constant 0 : i32
    %c0_i32_1 = arith.constant 0 : i32
    return %c0_i32, %c0_i32_0 : i32, i32
  }
  func.func @transform_6(%arg0: i32) -> (i32, i32) {
    %c0_i32 = arith.constant 0 : i32
    %c0_i32_0 = arith.constant 0 : i32
    %c0_i32_1 = arith.constant 0 : i32
    return %c0_i32, %c0_i32_0 : i32, i32
  }
  func.func @transform_7(%arg0: i32) -> (i32, i32) {
    %c0_i32 = arith.constant 0 : i32
    %c0_i32_0 = arith.constant 0 : i32
    return %arg0, %c0_i32 : i32, i32
  }
}

</mosaic_0001>

<bundles_post_ra>
// kernel: loaded_nn_agent_forward.1
= control target key start
LH: loop header
LB: loop body
LE: loop exit
PB: predicated region body
PF: predicated region fallthrough
CT: control target
= control target key end

     0   :  { %12 = vsyncpa [#allocation3], 0  ;;  %s3447_s0 = inlined_call_operand.vmem [shape: f32[16,16], index: 0, kind: input, shape index: {}]   ;;  %s3448_s1 = inlined_call_operand.vmem [shape: bf16[16,512], index: 1, kind: input, shape index: {}]   ;;  %s3449_s2 = inlined_call_operand.hbm [shape: bf16[512,512], index: 2, kind: input, shape index: {}]   ;;  %s3450_s3 = inlined_call_operand.hbm [shape: bf16[512,256], index: 3, kind: input, shape index: {}]   ;;  %s3451_s4 = inlined_call_operand.hbm [shape: bf16[256,128], index: 4, kind: input, shape index: {}]   ;;  %s3452_s5 = inlined_call_operand.hbm [shape: bf16[128,128], index: 5, kind: input, shape index: {}]   ;;  %s3453_s6 = inlined_call_operand.hbm [shape: f32[16,512], index: 6, kind: input, shape index: {}]   ;;  %s3454_s7 = inlined_call_operand.vmem [shape: bf16[16,128], index: 7, kind: output, shape index: {}]  }
   0x1   :  { %13 = vsyncpa [#allocation5], 0 }
   0x2   :  { %14 = vsyncpa [#allocation8], 0  ;;  %s3102_s24 = smov [#allocation4]   ;;  %s2986_s28 = scalar_lea.hbm %s3450_s3, 8192 }
   0x3   :  { %s36_s25 = sshll.u32 %s3102_s24, 4  ;;  %p2987_p0 = scmp.ne.s32.totalorder %s3450_s3, %s2986_s28  ;;  %s37_s25 = int_to_ptr.vmem [resolvable:$true] %s36_s25 }
   0x4   :  { %p2990_p1 = scmp.lt.u32.totalorder %s2986_s28, %s3450_s3 }
   0x6   :  { %p2992_p2 = pnand %p2990_p1, %p2987_p0 }
   0x8   :  { %2995 = shalt.err (!%p2992_p2)
}
   0x9   :  { %s2996_s10 = scalar_lea.vmem %s37_s25, 8192  ;;  %p3001_p4 = scmp.lt.s32.totalorder %s37_s25, %s37_s25 }
   0xa   :  { %p2997_p3 = scmp.ne.s32.totalorder %s37_s25, %s2996_s10  ;;  %p3002_p5 = scmp.lt.s32.totalorder %s2996_s10, %s2996_s10 }
   0xc   :  { %p3003_p6 = por %p3002_p5, %p3001_p4 }
   0xe   :  { %p3004_p7 = pnand %p3003_p6, %p2997_p3 }
  0x10   :  { %3007 = shalt.err (!%p3004_p7)
}
  0x11   :  { %s3103_s11 = smov 128   ;;  %s3104_s12 = smov 8  }
  0x12   :  { %42 = dma.hbm_to_vmem [thread:$0]  %s3450_s3, 8192, %s37_s25, [#allocation5], %s3103_s11, %s3103_s11, %s3104_s12  }
  0x13   :  { %s3105_s15 = smov [#allocation7]   ;;  %s3106_s17 = smov [#allocation2]  }
  0x14   :  { %s60_s16 = sshll.u32 %s3105_s15, 4  ;;  %s24_s18 = sshll.u32 %s3106_s17, 4  ;;  %s61_s16 = int_to_ptr.vmem [resolvable:$true] %s60_s16  ;;  %s25_s18 = int_to_ptr.vmem [resolvable:$true] %s24_s18 }
  0x15   :  { %s3008_s21 = scalar_lea.hbm %s3452_s5, 1024 }
  0x16   :  { %p3009_p8 = scmp.ne.s32.totalorder %s3452_s5, %s3008_s21  ;;  %p3012_p9 = scmp.lt.u32.totalorder %s3008_s21, %s3452_s5 }
  0x18   :  { %p3014_p10 = pnand %p3012_p9, %p3009_p8 }
  0x1a   :  { %3017 = shalt.err (!%p3014_p10)
}
  0x1b   :  { %s3018_s3 = scalar_lea.vmem %s61_s16, 1024  ;;  %p3023_p12 = scmp.lt.s32.totalorder %s61_s16, %s61_s16 }
  0x1c   :  { %p3019_p11 = scmp.ne.s32.totalorder %s61_s16, %s3018_s3  ;;  %p3024_p13 = scmp.lt.s32.totalorder %s3018_s3, %s3018_s3 }
  0x1e   :  { %p3025_p0 = por %p3024_p13, %p3023_p12 }
  0x20   :  { %p3026_p1 = pnand %p3025_p0, %p3019_p11 }
  0x22   :  { %3029 = shalt.err (!%p3026_p1)
}
  0x23   :  { %s3107_s25 = smov 64   ;;  %s3108_s27 = smov 4  }
  0x24   :  { %66 = dma.hbm_to_vmem [thread:$0]  %s3452_s5, 1024, %s61_s16, [#allocation8], %s3107_s25, %s3107_s25, %s3108_s27  }
  0x25   :  { %s3030_s9 = scalar_lea.hbm %s3449_s2, 16384 }
  0x26   :  { %p3031_p2 = scmp.ne.s32.totalorder %s3449_s2, %s3030_s9  ;;  %p3034_p3 = scmp.lt.u32.totalorder %s3030_s9, %s3449_s2 }
  0x28   :  { %p3036_p4 = pnand %p3034_p3, %p3031_p2 }
  0x2a   :  { %3039 = shalt.err (!%p3036_p4)
}
  0x2b   :  { %s3040_s14 = scalar_lea.vmem %s25_s18, 16384  ;;  %p3045_p6 = scmp.lt.s32.totalorder %s25_s18, %s25_s18 }
  0x2c   :  { %p3041_p5 = scmp.ne.s32.totalorder %s25_s18, %s3040_s14  ;;  %p3046_p7 = scmp.lt.s32.totalorder %s3040_s14, %s3040_s14 }
  0x2e   :  { %p3047_p8 = por %p3046_p7, %p3045_p6 }
  0x30   :  { %p3048_p9 = pnand %p3047_p8, %p3041_p5 }
  0x32   :  { %3051 = shalt.err (!%p3048_p9)
}
  0x33   :  { %s3109_s5 = smov 256   ;;  %s3110_s15 = smov 16  }
  0x34   :  { %30 = dma.hbm_to_vmem [thread:$0]  %s3449_s2, 16384, %s25_s18, [#allocation3], %s3109_s5, %s3109_s5, %s3110_s15  }
  0x35   :  { %s3111_s19 = smov [#allocation6]   ;;  %s3112_s21 = smov [#allocation9]  }
  0x36   :  { %s48_s20 = sshll.u32 %s3111_s19, 4  ;;  %s72_s22 = sshll.u32 %s3112_s21, 4  ;;  %s49_s20 = int_to_ptr.vmem [resolvable:$true] %s48_s20  ;;  %s73_s22 = int_to_ptr.vmem [resolvable:$true] %s72_s22 }
  0x37   :  { %s3052_s26 = scalar_lea.hbm %s3451_s4, 2048 }
  0x38   :  { %p3053_p10 = scmp.ne.s32.totalorder %s3451_s4, %s3052_s26  ;;  %p3056_p11 = scmp.lt.u32.totalorder %s3052_s26, %s3451_s4 }
  0x3a   :  { %p3058_p12 = pnand %p3056_p11, %p3053_p10 }
  0x3c   :  { %3061 = shalt.err (!%p3058_p12)
}
  0x3d   :  { %s3062_s2 = scalar_lea.vmem %s49_s20, 2048  ;;  %p3067_p0 = scmp.lt.s32.totalorder %s49_s20, %s49_s20 }
  0x3e   :  { %p3063_p13 = scmp.ne.s32.totalorder %s49_s20, %s3062_s2  ;;  %p3068_p1 = scmp.lt.s32.totalorder %s3062_s2, %s3062_s2 }
  0x40   :  { %p3069_p2 = por %p3068_p1, %p3067_p0 }
  0x42   :  { %p3070_p3 = pnand %p3069_p2, %p3063_p13 }
  0x44   :  { %3073 = shalt.err (!%p3070_p3)
}
  0x45   :  { %54 = dma.hbm_to_vmem [thread:$0]  %s3451_s4, 2048, %s49_s20, [#allocation5], %s3107_s25, %s3107_s25, %s3108_s27  }
  0x46   :  { %s3074_s11 = scalar_lea.hbm %s3453_s6, 1024 }
  0x47   :  { %p3075_p4 = scmp.ne.s32.totalorder %s3453_s6, %s3074_s11  ;;  %p3078_p5 = scmp.lt.u32.totalorder %s3074_s11, %s3453_s6 }
  0x49   :  { %p3080_p6 = pnand %p3078_p5, %p3075_p4 }
  0x4b   :  { %3083 = shalt.err (!%p3080_p6)
}
  0x4c   :  { %s3084_s15 = scalar_lea.vmem %s73_s22, 1024  ;;  %p3089_p8 = scmp.lt.s32.totalorder %s73_s22, %s73_s22 }
  0x4d   :  { %p3085_p7 = scmp.ne.s32.totalorder %s73_s22, %s3084_s15  ;;  %p3090_p9 = scmp.lt.s32.totalorder %s3084_s15, %s3084_s15 }
  0x4f   :  { %p3091_p10 = por %p3090_p9, %p3089_p8 }
  0x51   :  { %p3092_p11 = pnand %p3091_p10, %p3085_p7 }
  0x53   :  { %3095 = shalt.err (!%p3092_p11)
}
  0x54   :  { %s3113_s4 = smov 512   ;;  %s3114_s25 = smov 32  }
  0x55   :  { %78 = dma.hbm_to_vmem [thread:$0]  %s3453_s6, 1024, %s73_s22, [#allocation8], %s3113_s4, %s3113_s4, %s3114_s25  }
  0x56   :  { %3096 = dma.done.wait [#allocation3], 16384  }
  0x57   :  { %3097 = vsyncadd [#allocation3], 4294950912 }
  0x58   :  { %3098 = dma.done.wait [#allocation5], 10240  }
  0x59   :  { %3099 = vsyncadd [#allocation5], 4294957056 }
  0x5a   :  { %3100 = dma.done.wait [#allocation8], 2048  }
  0x5b   :  { %3101 = vsyncadd [#allocation8], 4294965248  ;;  %v3115_v0 = vmov 0   ;;  %v2656_v1 = vld [vmem:[%s3448_s1 + $0x4] ss:$16 sps:$4 sm:$0xff]   ;;  %v115_v4 = vld [vmem:[%s3447_s0 + $0x8] sm:$0xff]  ;;  %v122_v39 = vlaneseq }
  0x5c   :  { %198 = vmatprep.mubr.bf16.mxu1 %v3115_v0  ;;  %v2658_v2 = vld [vmem:[%s3448_s1] ss:$16 sps:$4 sm:$0xff]   ;;  %166 = vmatprep.subr.bf16.mxu1 %v2656_v1  ;;  %vm162_vm0 = vcmask 130048   ;;  %v2659_v6 = vld [vmem:[%s3448_s1 + $0x8] ss:$16 sps:$4 sm:$0xff]   ;;  %vm3117_vm1 = vmmov 0  }
  0x5d   :  { %v114_v3 = vld [vmem:[%s3447_s0] sm:$0xff]  ;;  %167 = vmatpush1.bf16.msra.mxu1 %v2658_v2  ;;  %v2661_v7 = vld [vmem:[%s3448_s1 + $0xc] ss:$16 sps:$4 sm:$0xff]   ;;  %v2664_v9 = vld [vmem:[#allocation2 + $0x8] ss:$16 sps:$4 sm:$0xff]   ;;  %v123_v40 = vshrl.u32 %v122_v39, 7 }
  0x5e   :  { %v116_v5 = vpack.c.bf16 %v115_v4, %v114_v3  ;;  %209 = vmatprep.subr.bf16.mxu1 %v2661_v7  ;;  %v2662_v8 = vld [vmem:[#allocation2 + $0x4] ss:$16 sps:$4 sm:$0xff]   ;;  %v2666_v10 = vld [vmem:[#allocation2 + $0xc] ss:$16 sps:$4 sm:$0xff]   ;;  %v2667_v11 = vld [vmem:[#allocation2] ss:$16 sps:$4 sm:$0xff]  }
  0x5f   :  { %v2668_v12 = vld [vmem:[#allocation2 + $0x24] ss:$16 sps:$4 sm:$0xff]   ;;  %1169 = vmatprep.subr.bf16.mxu0 %v2662_v8  ;;  %v2672_v13 = vld [vmem:[#allocation2 + $0x2c] ss:$16 sps:$4 sm:$0xff]   ;;  %v2670_v14 = vld [vmem:[#allocation2 + $0x28] ss:$16 sps:$4 sm:$0xff]  }
  0x60   :  { %2338 = vmatmul.mubr.msk.bf16.vlgmr.msra.gmra.mrb[0].mxu1 %vm162_vm0, %v116_v5  ;;  %1170 = vmatpush1.bf16.msra.mxu0 %v2667_v11  ;;  %v2673_v15 = vld [vmem:[#allocation2 + $0x20] ss:$16 sps:$4 sm:$0xff]   ;;  %v2674_v16 = vld [vmem:[#allocation2 + $0x44] ss:$16 sps:$4 sm:$0xff]   ;;  %v2678_v17 = vld [vmem:[#allocation2 + $0x4c] ss:$16 sps:$4 sm:$0xff]  }
  0x61   :  { %210 = vmatpush1.bf16.msra.mxu1 %v2659_v6  ;;  %241 = vmatprep.mubr.bf16.mxu1 %v3115_v0  ;;  %v2676_v18 = vld [vmem:[#allocation2 + $0x48] ss:$16 sps:$4 sm:$0xff]   ;;  %v2679_v19 = vld [vmem:[#allocation2 + $0x40] ss:$16 sps:$4 sm:$0xff]   ;;  %v2680_v20 = vld [vmem:[#allocation2 + $0x64] ss:$16 sps:$4 sm:$0xff]  }
  0x62   :  { %1255 = vmatprep.subr.bf16.mxu1 %v2666_v10  ;;  %1171 = vmatprep.subr.bf16.mxu0 %v2668_v12  ;;  %v2684_v21 = vld [vmem:[#allocation2 + $0x6c] ss:$16 sps:$4 sm:$0xff]   ;;  %v2682_v22 = vld [vmem:[#allocation2 + $0x68] ss:$16 sps:$4 sm:$0xff]   ;;  %v2685_v23 = vld [vmem:[#allocation2 + $0x60] ss:$16 sps:$4 sm:$0xff]  }
  0x63   :  { %v2686_v24 = vld [vmem:[#allocation2 + $0x84] ss:$16 sps:$4 sm:$0xff]   ;;  %v2690_v25 = vld [vmem:[#allocation2 + $0x8c] ss:$16 sps:$4 sm:$0xff]   ;;  %v2688_v26 = vld [vmem:[#allocation2 + $0x88] ss:$16 sps:$4 sm:$0xff]  }
  0x64   :  { %1172 = vmatpush1.bf16.msra.mxu0 %v2673_v15  ;;  %v2691_v27 = vld [vmem:[#allocation2 + $0x80] ss:$16 sps:$4 sm:$0xff]   ;;  %v2692_v28 = vld [vmem:[#allocation2 + $0xa4] ss:$16 sps:$4 sm:$0xff]   ;;  %v2696_v29 = vld [vmem:[#allocation2 + $0xac] ss:$16 sps:$4 sm:$0xff]  }
  0x65   :  { %1173 = vmatprep.subr.bf16.mxu0 %v2674_v16  ;;  %v2694_v30 = vld [vmem:[#allocation2 + $0xa8] ss:$16 sps:$4 sm:$0xff]   ;;  %v2697_v31 = vld [vmem:[#allocation2 + $0xa0] ss:$16 sps:$4 sm:$0xff]   ;;  %v2698_v32 = vld [vmem:[#allocation2 + $0xc4] ss:$16 sps:$4 sm:$0xff]  }
  0x66   :  { %v2702_v33 = vld [vmem:[#allocation2 + $0xcc] ss:$16 sps:$4 sm:$0xff]   ;;  %v2700_v34 = vld [vmem:[#allocation2 + $0xc8] ss:$16 sps:$4 sm:$0xff]   ;;  %v2703_v35 = vld [vmem:[#allocation2 + $0xc0] ss:$16 sps:$4 sm:$0xff]  }
  0x67   :  { %v2704_v36 = vld [vmem:[#allocation2 + $0xe4] ss:$16 sps:$4 sm:$0xff]   ;;  %v2708_v37 = vld [vmem:[#allocation2 + $0xec] ss:$16 sps:$4 sm:$0xff]   ;;  %v2706_v38 = vld [vmem:[#allocation2 + $0xe8] ss:$16 sps:$4 sm:$0xff]  }
  0x68   :  { %2339 = vmatmul.mubr.msk.bf16.vlgmr.msra.gmra.mrb[4].mxu1 %vm162_vm0, %v116_v5  ;;  %1174 = vmatpush1.bf16.msra.mxu0 %v2679_v19  ;;  %v3242_v41 = vsub.s32 0, %v123_v40  ;;  %v3244_v42 = vsub.s32 1, %v123_v40  ;;  %v95_v43 = vld [vmem:[#allocation9] ss:$8 sm:$0xf]  ;;  %v3248_v48 = vsub.s32 2, %v123_v40 }
  0x69   :  { %1256 = vmatpush1.bf16.msra.mxu1 %v2664_v9  ;;  %1175 = vmatprep.subr.bf16.mxu0 %v2680_v20  ;;  %v3250_v50 = vsub.s32 3, %v123_v40  ;;  %v2734_v39 = vld [vmem:[#allocation2 + $0x184] ss:$16 sps:$4 sm:$0xff]   ;;  %v2738_v40 = vld [vmem:[#allocation2 + $0x18c] ss:$16 sps:$4 sm:$0xff]  }
  0x6a   :  { %1257 = vmatprep.subr.bf16.mxu1 %v2672_v13  ;;  %v125_v44 = vrot.slane %v95_v43, %v3242_v41  ;;  %v129_v45 = vrot.slane %v95_v43, %v3244_v42  ;;  %v133_v56 = vrot.slane %v95_v43, %v3248_v48 }
  0x6b   :  { %v137_v57 = vrot.slane %v95_v43, %v3250_v50  ;;  %v2736_v43 = vld [vmem:[#allocation2 + $0x188] ss:$16 sps:$4 sm:$0xff]  }
  0x6c   :  { %1176 = vmatpush1.bf16.msra.mxu0 %v2685_v23  ;;  %v2710_v23 = vld [vmem:[#allocation2 + $0x104] ss:$16 sps:$4 sm:$0xff]  }
  0x6d   :  { %1258 = vmatpush1.bf16.msra.mxu1 %v2670_v14  ;;  %1177 = vmatprep.subr.bf16.mxu0 %v2686_v24  ;;  %v2714_v24 = vld [vmem:[#allocation2 + $0x10c] ss:$16 sps:$4 sm:$0xff]  }
  0x6e   :  { %1259 = vmatprep.subr.bf16.mxu1 %v2678_v17 }
  0x70   :  { %1178 = vmatpush1.bf16.msra.mxu0 %v2691_v27  ;;  %v2716_v27 = vld [vmem:[#allocation2 + $0x124] ss:$16 sps:$4 sm:$0xff]  }
  0x71   :  { %1260 = vmatpush1.bf16.msra.mxu1 %v2676_v18  ;;  %1179 = vmatprep.subr.bf16.mxu0 %v2692_v28  ;;  %v2720_v28 = vld [vmem:[#allocation2 + $0x12c] ss:$16 sps:$4 sm:$0xff]  }
  0x72   :  { %1261 = vmatprep.subr.bf16.mxu1 %v2684_v21 }
  0x74   :  { %1180 = vmatpush1.bf16.msra.mxu0 %v2697_v31  ;;  %v2722_v31 = vld [vmem:[#allocation2 + $0x144] ss:$16 sps:$4 sm:$0xff]  }
  0x75   :  { %1262 = vmatpush1.bf16.msra.mxu1 %v2682_v22  ;;  %1181 = vmatprep.subr.bf16.mxu0 %v2698_v32  ;;  %v2709_v22 = vld [vmem:[#allocation2 + $0xe0] ss:$16 sps:$4 sm:$0xff]   ;;  %v2726_v32 = vld [vmem:[#allocation2 + $0x14c] ss:$16 sps:$4 sm:$0xff]  }
  0x76   :  { %1263 = vmatprep.subr.bf16.mxu1 %v2690_v25  ;;  %v2712_v25 = vld [vmem:[#allocation2 + $0x108] ss:$16 sps:$4 sm:$0xff]  }
  0x78   :  { %1182 = vmatpush1.bf16.msra.mxu0 %v2703_v35  ;;  %v2728_v35 = vld [vmem:[#allocation2 + $0x164] ss:$16 sps:$4 sm:$0xff]  }
  0x79   :  { %1264 = vmatpush1.bf16.msra.mxu1 %v2688_v26  ;;  %1183 = vmatprep.subr.bf16.mxu0 %v2704_v36  ;;  %v2715_v26 = vld [vmem:[#allocation2 + $0x100] ss:$16 sps:$4 sm:$0xff]   ;;  %v2732_v36 = vld [vmem:[#allocation2 + $0x16c] ss:$16 sps:$4 sm:$0xff]  }
  0x7a   :  { %1265 = vmatprep.subr.bf16.mxu1 %v2696_v29  ;;  %v2718_v29 = vld [vmem:[#allocation2 + $0x128] ss:$16 sps:$4 sm:$0xff]  }
  0x7c   :  { %1184 = vmatpush1.bf16.msra.mxu0 %v2709_v22  ;;  %v99_v22 = vld [vmem:[#allocation9 + $0x2] ss:$8 sm:$0xf] }
  0x7d   :  { %1266 = vmatpush1.bf16.msra.mxu1 %v2694_v30  ;;  %1185 = vmatprep.subr.bf16.mxu0 %v2710_v23  ;;  %v2721_v30 = vld [vmem:[#allocation2 + $0x120] ss:$16 sps:$4 sm:$0xff]  }
  0x7e   :  { %1267 = vmatprep.subr.bf16.mxu1 %v2702_v33  ;;  %v2724_v33 = vld [vmem:[#allocation2 + $0x148] ss:$16 sps:$4 sm:$0xff]  }
  0x80   :  { %1186 = vmatpush1.bf16.msra.mxu0 %v2715_v26 }
  0x81   :  { %1268 = vmatpush1.bf16.msra.mxu1 %v2700_v34  ;;  %1187 = vmatprep.subr.bf16.mxu0 %v2716_v27  ;;  %v2727_v34 = vld [vmem:[#allocation2 + $0x140] ss:$16 sps:$4 sm:$0xff]  }
  0x82   :  { %1269 = vmatprep.subr.bf16.mxu1 %v2708_v37  ;;  %v2730_v37 = vld [vmem:[#allocation2 + $0x168] ss:$16 sps:$4 sm:$0xff]  }
  0x84   :  { %1188 = vmatpush1.bf16.msra.mxu0 %v2721_v30 }
  0x85   :  { %1270 = vmatpush1.bf16.msra.mxu1 %v2706_v38  ;;  %1189 = vmatprep.subr.bf16.mxu0 %v2722_v31  ;;  %v2733_v38 = vld [vmem:[#allocation2 + $0x160] ss:$16 sps:$4 sm:$0xff]  }
  0x86   :  { %1271 = vmatprep.subr.bf16.mxu1 %v2714_v24 }
  0x88   :  { %1190 = vmatpush1.bf16.msra.mxu0 %v2727_v34 }
  0x89   :  { %1272 = vmatpush1.bf16.msra.mxu1 %v2712_v25  ;;  %1191 = vmatprep.subr.bf16.mxu0 %v2728_v35 }
  0x8a   :  { %1273 = vmatprep.subr.bf16.mxu1 %v2720_v28 }
  0x8c   :  { %1192 = vmatpush1.bf16.msra.mxu0 %v2733_v38 }
  0x8d   :  { %1274 = vmatpush1.bf16.msra.mxu1 %v2718_v29  ;;  %1193 = vmatprep.subr.bf16.mxu0 %v2734_v39 }
  0x8e   :  { %1275 = vmatprep.subr.bf16.mxu1 %v2726_v32 }
  0x91   :  { %1276 = vmatpush1.bf16.msra.mxu1 %v2724_v33  ;;  %v347_v33 = vrot.slane %v99_v22, %v3244_v42 }
  0x92   :  { %1277 = vmatprep.subr.bf16.mxu1 %v2732_v36 }
  0x95   :  { %1278 = vmatpush1.bf16.msra.mxu1 %v2730_v37 }
  0x96   :  { %1279 = vmatprep.subr.bf16.mxu1 %v2738_v40 }
  0x99   :  { %1280 = vmatpush1.bf16.msra.mxu1 %v2736_v43 }
 0x133   :  { %v200_v46 = vpop.f32.mrb[0].mxu1 }
 0x134   :  { %v202_v47 = vpop.f32.mrb[1].mxu1  ;;  %v3252_v51 = vadd.f32 %v200_v46, %v125_v44  ;;  %v2744_v46 = vld [vmem:[#allocation2 + $0x1ac] ss:$16 sps:$4 sm:$0xff]  }
 0x135   :  { %v204_v49 = vpop.f32.mrb[2].mxu1  ;;  %v3254_v52 = vadd.f32 %v202_v47, %v129_v45  ;;  %v2742_v47 = vld [vmem:[#allocation2 + $0x1a8] ss:$16 sps:$4 sm:$0xff]   ;;  %1281 = vmatprep.subr.bf16.mxu1 %v2744_v46 }
 0x136   :  { %v206_v53 = vpop.f32.mrb[3].mxu1  ;;  %v3256_v54 = vadd.f32 %v204_v49, %v125_v44  ;;  %v262_v58 = vmul.f32 %v3252_v51, %v3252_v51  ;;  %v2739_v44 = vld [vmem:[#allocation2 + $0x180] ss:$16 sps:$4 sm:$0xff]   ;;  %1282 = vmatpush1.bf16.msra.mxu1 %v2742_v47  ;;  %v355_v47 = vrot.slane %v99_v22, %v3250_v50 }
 0x137   :  { %v3258_v55 = vadd.f32 %v206_v53, %v129_v45  ;;  %v263_v59 = vmul.f32 %v3254_v52, %v3254_v52  ;;  %v252_v1 = vadd.f32 %v3254_v52, %v3252_v51  ;;  %v2740_v45 = vld [vmem:[#allocation2 + $0x1a4] ss:$16 sps:$4 sm:$0xff]   ;;  %1194 = vmatpush1.bf16.msra.mxu0 %v2739_v44  ;;  %v2745_v49 = vld [vmem:[#allocation2 + $0x1a0] ss:$16 sps:$4 sm:$0xff]  }
 0x138   :  { %v266_v60 = vmul.f32 %v3256_v54, %v3256_v54  ;;  %1195 = vmatprep.subr.bf16.mxu0 %v2740_v45  ;;  %v2746_v53 = vld [vmem:[#allocation2 + $0x1c4] ss:$16 sps:$4 sm:$0xff]  }
 0x139   :  { %v267_v61 = vmul.f32 %v3258_v55, %v3258_v55  ;;  %v253_v2 = vadd.f32 %v3258_v55, %v3256_v54  ;;  %v270_v9 = vadd.f32 %v263_v59, %v262_v58  ;;  %v2751_v58 = vld [vmem:[#allocation2 + $0x1c0] ss:$16 sps:$4 sm:$0xff]   ;;  %v2752_v59 = vld [vmem:[#allocation2 + $0x1e4] ss:$16 sps:$4 sm:$0xff]  }
 0x13b   :  { %v243_v62 = vpop.f32.mrb[4].mxu1  ;;  %v271_v12 = vadd.f32 %v267_v61, %v266_v60  ;;  %1196 = vmatpush1.bf16.msra.mxu0 %v2745_v49  ;;  %v2756_v60 = vld [vmem:[#allocation2 + $0x1ec] ss:$16 sps:$4 sm:$0xff]   ;;  %v2754_v61 = vld [vmem:[#allocation2 + $0x1e8] ss:$16 sps:$4 sm:$0xff]  }
 0x13c   :  { %v3270_v63 = vadd.f32 %v243_v62, %v133_v56  ;;  %v245_v0 = vpop.f32.mrb[5].mxu1  ;;  %1197 = vmatprep.subr.bf16.mxu0 %v2746_v53  ;;  %v2757_v62 = vld [vmem:[#allocation2 + $0x1e0] ss:$16 sps:$4 sm:$0xff]  }
 0x13d   :  { %v3276_v3 = vadd.f32 %v245_v0, %v137_v57  ;;  %v247_v4 = vpop.f32.mrb[6].mxu1  ;;  %v2760_v0 = vld [vmem:[#allocation2 + $0x204] ss:$16 sps:$4 sm:$0xff]  }
 0x13e   :  { %v3278_v5 = vadd.f32 %v247_v4, %v133_v56  ;;  %v249_v6 = vpop.f32.mrb[7].mxu1  ;;  %v254_v7 = vadd.f32 %v252_v1, %v3270_v63  ;;  %v264_v8 = vmul.f32 %v3270_v63, %v3270_v63  ;;  %v2750_v56 = vld [vmem:[#allocation2 + $0x1cc] ss:$16 sps:$4 sm:$0xff]  }
 0x13f   :  { %v3283_v10 = vadd.f32 %v249_v6, %v137_v57  ;;  %v265_v11 = vmul.f32 %v3276_v3, %v3276_v3  ;;  %v2748_v57 = vld [vmem:[#allocation2 + $0x1c8] ss:$16 sps:$4 sm:$0xff]   ;;  %1283 = vmatprep.subr.bf16.mxu1 %v2750_v56  ;;  %1198 = vmatpush1.bf16.msra.mxu0 %v2751_v58  ;;  %v2763_v1 = vld [vmem:[#allocation2 + $0x20c] ss:$16 sps:$4 sm:$0xff]  }
 0x140   :  { %v268_v13 = vmul.f32 %v3278_v5, %v3278_v5  ;;  %v256_v14 = vadd.f32 %v254_v7, %v3276_v3  ;;  %v272_v15 = vadd.f32 %v270_v9, %v264_v8  ;;  %v255_v16 = vadd.f32 %v253_v2, %v3278_v5  ;;  %1284 = vmatpush1.bf16.msra.mxu1 %v2748_v57 }
 0x141   :  { %v269_v18 = vmul.f32 %v3283_v10, %v3283_v10  ;;  %1199 = vmatprep.subr.bf16.mxu0 %v2752_v59  ;;  %1285 = vmatprep.subr.bf16.mxu1 %v2756_v60 }
 0x142   :  { %258 = vadd.xlane.f32.xlu0 %v256_v14  ;;  %v274_v17 = vadd.f32 %v272_v15, %v265_v11  ;;  %v273_v19 = vadd.f32 %v271_v12, %v268_v13  ;;  %v257_v20 = vadd.f32 %v255_v16, %v3283_v10 }
 0x143   :  { %1200 = vmatpush1.bf16.msra.mxu0 %v2757_v62 }
 0x144   :  { %276 = vadd.xlane.f32.xlu1 %v274_v17  ;;  %v275_v21 = vadd.f32 %v273_v19, %v269_v18  ;;  %1286 = vmatpush1.bf16.msra.mxu1 %v2754_v61 }
 0x145   :  { %1212 = vmatprep.subr.bf16.mxu0 %v2760_v0  ;;  %1298 = vmatprep.subr.bf16.mxu1 %v2763_v1 }
 0x146   :  { %260 = vadd.xlane.f32.xlu0 %v257_v20 }
 0x148   :  { %278 = vadd.xlane.f32.xlu1 %v275_v21  ;;  %v97_v21 = vld [vmem:[#allocation9 + $0x1] ss:$8 sm:$0xf] }
 0x149   :  { %v318_v23 = vrot.slane %v97_v21, %v3244_v42  ;;  %v314_v24 = vrot.slane %v97_v21, %v3242_v41  ;;  %v322_v28 = vrot.slane %v97_v21, %v3248_v48  ;;  %v326_v31 = vrot.slane %v97_v21, %v3250_v50  ;;  %v2764_v21 = vld [vmem:[#allocation2 + $0x220] ss:$16 sps:$4 sm:$0xff]  }
 0x1cf   :  { %v259_v2 = vpop.xlane.xlu0 %258 }
 0x1d0   :  { %v280_v4 = vmul.f32 0.001953125, %v259_v2 }
 0x1d1   :  { %v277_v6 = vpop.xlane.xlu1 %276 }
 0x1d2   :  { %v282_v7 = vmul.f32 0.001953125, %v277_v6  ;;  %v284_v8 = vmul.f32 %v280_v4, %v280_v4  ;;  %v290_v25 = vsub.f32 %v3252_v51, %v280_v4  ;;  %v291_v26 = vsub.f32 %v3254_v52, %v280_v4 }
 0x1d3   :  { %v261_v9 = vpop.xlane.xlu0 %260  ;;  %v292_v27 = vsub.f32 %v3270_v63, %v280_v4  ;;  %v293_v30 = vsub.f32 %v3276_v3, %v280_v4  ;;  %v343_v51 = vrot.slane %v99_v22, %v3242_v41  ;;  %v351_v52 = vrot.slane %v99_v22, %v3248_v48  ;;  %v2767_v22 = vld [vmem:[#allocation2 + $0x228] ss:$16 sps:$4 sm:$0xff]  }
 0x1d4   :  { %v281_v11 = vmul.f32 0.001953125, %v261_v9  ;;  %v286_v12 = vsub.f32 %v282_v7, %v284_v8 }
 0x1d5   :  { %v279_v13 = vpop.xlane.xlu1 %278 }
 0x1d6   :  { %v288_v14 = vmax.f32 %v286_v12, 0.0  ;;  %v283_v15 = vmul.f32 0.001953125, %v279_v13  ;;  %v285_v16 = vmul.f32 %v281_v11, %v281_v11  ;;  %v294_v36 = vsub.f32 %v3256_v54, %v281_v11  ;;  %v2758_v13 = vld [vmem:[#allocation2 + $0x200] ss:$16 sps:$4 sm:$0xff]  }
 0x1d7   :  { %v295_v63 = vsub.f32 %v3258_v55, %v281_v11  ;;  %v296_v43 = vsub.f32 %v3278_v5, %v281_v11  ;;  %v297_v44 = vsub.f32 %v3283_v10, %v281_v11 }
 0x1d8   :  { %v298_v17 = vadd.f32 1e-05, %v288_v14  ;;  %v287_v18 = vsub.f32 %v283_v15, %v285_v16  ;;  %v2761_v14 = vld [vmem:[#allocation2 + $0x208] ss:$16 sps:$4 sm:$0xff]  }
 0x1da   :  { %2974 = vrsqrt.f32 %v298_v17  ;;  %v289_v19 = vmax.f32 %v287_v18, 0.0  ;;  %v2766_v18 = vld [vmem:[#allocation2 + $0x224] ss:$16 sps:$4 sm:$0xff]  }
 0x1dc   :  { %v299_v20 = vadd.f32 1e-05, %v289_v19  ;;  %v2769_v19 = vld [vmem:[#allocation2 + $0x22c] ss:$16 sps:$4 sm:$0xff]  }
 0x1de   :  { %2976 = vrsqrt.f32 %v299_v20 }
 0x1e4   :  { %v2975_v29 = vpop.eup %2974 }
 0x1e5   :  { %v303_v32 = vmul.f32 %v2975_v29, %v291_v26  ;;  %v302_v34 = vmul.f32 %v2975_v29, %v290_v25  ;;  %v304_v35 = vmul.f32 %v2975_v29, %v292_v27  ;;  %v305_v37 = vmul.f32 %v2975_v29, %v293_v30  ;;  %v2770_v25 = vld [vmem:[#allocation2 + $0x240] ss:$16 sps:$4 sm:$0xff]   ;;  %v2773_v26 = vld [vmem:[#allocation2 + $0x248] ss:$16 sps:$4 sm:$0xff]   ;;  %v2778_v27 = vld [vmem:[#allocation2 + $0x264] ss:$16 sps:$4 sm:$0xff]  }
 0x1e6   :  { %v2776_v29 = vld [vmem:[#allocation2 + $0x260] ss:$16 sps:$4 sm:$0xff]   ;;  %v2779_v30 = vld [vmem:[#allocation2 + $0x268] ss:$16 sps:$4 sm:$0xff]  }
 0x1e7   :  { %v332_v38 = vmul.f32 %v318_v23, %v303_v32  ;;  %v331_v39 = vmul.f32 %v314_v24, %v302_v34  ;;  %v333_v40 = vmul.f32 %v322_v28, %v304_v35  ;;  %v334_v49 = vmul.f32 %v326_v31, %v305_v37  ;;  %v2787_v32 = vld [vmem:[#allocation2 + $0x28c] ss:$16 sps:$4 sm:$0xff]   ;;  %v2785_v34 = vld [vmem:[#allocation2 + $0x288] ss:$16 sps:$4 sm:$0xff]   ;;  %v2790_v35 = vld [vmem:[#allocation2 + $0x2a4] ss:$16 sps:$4 sm:$0xff]  }
 0x1e8   :  { %v2977_v3 = vpop.eup %2976  ;;  %v2791_v37 = vld [vmem:[#allocation2 + $0x2a8] ss:$16 sps:$4 sm:$0xff]  }
 0x1e9   :  { %v307_v45 = vmul.f32 %v2977_v3, %v295_v63  ;;  %v306_v46 = vmul.f32 %v2977_v3, %v294_v36  ;;  %v309_v54 = vmul.f32 %v2977_v3, %v297_v44  ;;  %v308_v53 = vmul.f32 %v2977_v3, %v296_v43  ;;  %v2793_v36 = vld [vmem:[#allocation2 + $0x2ac] ss:$16 sps:$4 sm:$0xff]   ;;  %v2800_v43 = vld [vmem:[#allocation2 + $0x2e0] ss:$16 sps:$4 sm:$0xff]   ;;  %v2803_v44 = vld [vmem:[#allocation2 + $0x2e8] ss:$16 sps:$4 sm:$0xff]  }
 0x1ea   :  { %v362_v56 = vadd.f32 %v351_v52, %v333_v40  ;;  %v361_v58 = vadd.f32 %v347_v33, %v332_v38  ;;  %v360_v55 = vadd.f32 %v343_v51, %v331_v39  ;;  %v363_v1 = vadd.f32 %v355_v47, %v334_v49  ;;  %v2799_v63 = vld [vmem:[#allocation2 + $0x2cc] ss:$16 sps:$4 sm:$0xff]   ;;  %v2794_v38 = vld [vmem:[#allocation2 + $0x2c0] ss:$16 sps:$4 sm:$0xff]   ;;  %v2797_v39 = vld [vmem:[#allocation2 + $0x2c8] ss:$16 sps:$4 sm:$0xff]  }
 0x1eb   :  { %v336_v57 = vmul.f32 %v318_v23, %v307_v45  ;;  %v335_v59 = vmul.f32 %v314_v24, %v306_v46  ;;  %v338_v60 = vmul.f32 %v326_v31, %v309_v54  ;;  %v337_v61 = vmul.f32 %v322_v28, %v308_v53  ;;  %v2772_v23 = vld [vmem:[#allocation2 + $0x244] ss:$16 sps:$4 sm:$0xff]   ;;  %v2775_v24 = vld [vmem:[#allocation2 + $0x24c] ss:$16 sps:$4 sm:$0xff]   ;;  %v2809_v54 = vld [vmem:[#allocation2 + $0x308] ss:$16 sps:$4 sm:$0xff]  }
 0x1ec   :  { %v369_v10 = vmax.f32 %v361_v58, 0.0  ;;  %v368_v6 = vmax.f32 %v360_v55, 0.0  ;;  %v370_v9 = vmax.f32 %v362_v56, 0.0  ;;  %v371_v16 = vmax.f32 %v363_v1, 0.0  ;;  %v2781_v28 = vld [vmem:[#allocation2 + $0x26c] ss:$16 sps:$4 sm:$0xff]  }
 0x1ed   :  { %v365_v62 = vadd.f32 %v347_v33, %v336_v57  ;;  %v364_v0 = vadd.f32 %v343_v51, %v335_v59  ;;  %v367_v5 = vadd.f32 %v355_v47, %v338_v60  ;;  %v366_v2 = vadd.f32 %v351_v52, %v337_v61  ;;  %v2784_v31 = vld [vmem:[#allocation2 + $0x284] ss:$16 sps:$4 sm:$0xff]   ;;  %v2782_v33 = vld [vmem:[#allocation2 + $0x280] ss:$16 sps:$4 sm:$0xff]   ;;  %v2805_v3 = vld [vmem:[#allocation2 + $0x2ec] ss:$16 sps:$4 sm:$0xff]  }
 0x1ee   :  { %v2788_v51 = vld [vmem:[#allocation2 + $0x2a0] ss:$16 sps:$4 sm:$0xff]   ;;  %v2796_v52 = vld [vmem:[#allocation2 + $0x2c4] ss:$16 sps:$4 sm:$0xff]   ;;  %v2811_v46 = vld [vmem:[#allocation2 + $0x30c] ss:$16 sps:$4 sm:$0xff]  }
 0x1ef   :  { %v373_v4 = vmax.f32 %v365_v62, 0.0  ;;  %v372_v7 = vmax.f32 %v364_v0, 0.0  ;;  %v375_v8 = vmax.f32 %v367_v5, 0.0  ;;  %v374_v11 = vmax.f32 %v366_v2, 0.0  ;;  %v2802_v40 = vld [vmem:[#allocation2 + $0x2e4] ss:$16 sps:$4 sm:$0xff]  }
 0x1f0   :  { %v2808_v45 = vld [vmem:[#allocation2 + $0x304] ss:$16 sps:$4 sm:$0xff]   ;;  %v2806_v47 = vld [vmem:[#allocation2 + $0x300] ss:$16 sps:$4 sm:$0xff]   ;;  %v2817_v53 = vld [vmem:[#allocation2 + $0x32c] ss:$16 sps:$4 sm:$0xff]  }
 0x1f1   :  { %v3310_v12 = vpack.c.bf16 %v373_v4, %v369_v10  ;;  %v3312_v15 = vpack.c.bf16 %v372_v7, %v368_v6  ;;  %v3314_v17 = vpack.c.bf16 %v374_v11, %v370_v9  ;;  %v3320_v20 = vpack.c.bf16 %v375_v8, %v371_v16  ;;  %v2814_v49 = vld [vmem:[#allocation2 + $0x324] ss:$16 sps:$4 sm:$0xff]   ;;  %v2812_v56 = vld [vmem:[#allocation2 + $0x320] ss:$16 sps:$4 sm:$0xff]   ;;  %v2815_v57 = vld [vmem:[#allocation2 + $0x328] ss:$16 sps:$4 sm:$0xff]  }
 0x1f2   :  { %v2820_v58 = vld [vmem:[#allocation2 + $0x344] ss:$16 sps:$4 sm:$0xff]   ;;  %v2823_v59 = vld [vmem:[#allocation2 + $0x34c] ss:$16 sps:$4 sm:$0xff]   ;;  %v2818_v55 = vld [vmem:[#allocation2 + $0x340] ss:$16 sps:$4 sm:$0xff]  }
 0x1f3   :  { %1201 = vmatprep.mubr.bf16.mxu0 %v3310_v12  ;;  %1287 = vmatprep.mubr.bf16.mxu1 %v3310_v12  ;;  %v2821_v60 = vld [vmem:[#allocation2 + $0x348] ss:$16 sps:$4 sm:$0xff]   ;;  %v2826_v61 = vld [vmem:[#allocation2 + $0x364] ss:$16 sps:$4 sm:$0xff]   ;;  %v2829_v62 = vld [vmem:[#allocation2 + $0x36c] ss:$16 sps:$4 sm:$0xff]  }
 0x1f4   :  { %1202 = vmatmul.mubr.bf16.vlgmr.msra.gmra.mrb[0].mxu0 %v3312_v15  ;;  %1288 = vmatmul.mubr.bf16.vlgmr.msra.gmra.mrb[8].mxu1 %v3312_v15  ;;  %v2824_v0 = vld [vmem:[#allocation2 + $0x360] ss:$16 sps:$4 sm:$0xff]   ;;  %v2827_v1 = vld [vmem:[#allocation2 + $0x368] ss:$16 sps:$4 sm:$0xff]   ;;  %v2832_v5 = vld [vmem:[#allocation2 + $0x384] ss:$16 sps:$4 sm:$0xff]  }
 0x1f5   :  { %1213 = vmatpush1.bf16.msra.mxu0 %v2758_v13  ;;  %1299 = vmatpush1.bf16.msra.mxu1 %v2761_v14  ;;  %v2835_v2 = vld [vmem:[#allocation2 + $0x38c] ss:$16 sps:$4 sm:$0xff]   ;;  %v2830_v10 = vld [vmem:[#allocation2 + $0x380] ss:$16 sps:$4 sm:$0xff]   ;;  %v2833_v4 = vld [vmem:[#allocation2 + $0x388] ss:$16 sps:$4 sm:$0xff]  }
 0x1f6   :  { %1244 = vmatprep.mubr.bf16.mxu0 %v3320_v20  ;;  %1330 = vmatprep.mubr.bf16.mxu1 %v3320_v20  ;;  %v2838_v6 = vld [vmem:[#allocation2 + $0x3a4] ss:$16 sps:$4 sm:$0xff]   ;;  %v2841_v7 = vld [vmem:[#allocation2 + $0x3ac] ss:$16 sps:$4 sm:$0xff]   ;;  %v2836_v8 = vld [vmem:[#allocation2 + $0x3a0] ss:$16 sps:$4 sm:$0xff]  }
 0x1f7   :  { %1214 = vmatprep.subr.bf16.mxu0 %v2766_v18  ;;  %1300 = vmatprep.subr.bf16.mxu1 %v2769_v19  ;;  %v2839_v9 = vld [vmem:[#allocation2 + $0x3a8] ss:$16 sps:$4 sm:$0xff]   ;;  %v2844_v11 = vld [vmem:[#allocation2 + $0x3c4] ss:$16 sps:$4 sm:$0xff]   ;;  %v2847_v13 = vld [vmem:[#allocation2 + $0x3cc] ss:$16 sps:$4 sm:$0xff]  }
 0x1f8   :  { %v2842_v14 = vld [vmem:[#allocation2 + $0x3c0] ss:$16 sps:$4 sm:$0xff]   ;;  %v2845_v16 = vld [vmem:[#allocation2 + $0x3c8] ss:$16 sps:$4 sm:$0xff]   ;;  %v2850_v18 = vld [vmem:[#allocation2 + $0x3e4] ss:$16 sps:$4 sm:$0xff]  }
 0x1f9   :  { %1215 = vmatpush1.bf16.msra.mxu0 %v2764_v21  ;;  %1301 = vmatpush1.bf16.msra.mxu1 %v2767_v22  ;;  %v2853_v19 = vld [vmem:[#allocation2 + $0x3ec] ss:$16 sps:$4 sm:$0xff]   ;;  %v2848_v21 = vld [vmem:[#allocation2 + $0x3e0] ss:$16 sps:$4 sm:$0xff]   ;;  %v2851_v22 = vld [vmem:[#allocation2 + $0x3e8] ss:$16 sps:$4 sm:$0xff]  }
 0x1fa   :  { %1216 = vmatprep.subr.bf16.mxu0 %v2772_v23  ;;  %1302 = vmatprep.subr.bf16.mxu1 %v2775_v24  ;;  %v2854_v23 = vld [vmem:[#allocation4] ss:$8 sps:$4 sm:$0xff]   ;;  %v2856_v24 = vld [vmem:[#allocation4 + $0x4] ss:$8 sps:$4 sm:$0xff]  }
 0x1fd   :  { %1217 = vmatpush1.bf16.msra.mxu0 %v2770_v25  ;;  %1303 = vmatpush1.bf16.msra.mxu1 %v2773_v26  ;;  %v2859_v25 = vld [vmem:[#allocation4 + $0x14] ss:$8 sps:$4 sm:$0xff]   ;;  %v2857_v26 = vld [vmem:[#allocation4 + $0x10] ss:$8 sps:$4 sm:$0xff]  }
 0x1fe   :  { %1218 = vmatprep.subr.bf16.mxu0 %v2778_v27  ;;  %1304 = vmatprep.subr.bf16.mxu1 %v2781_v28  ;;  %v2862_v27 = vld [vmem:[#allocation4 + $0x24] ss:$8 sps:$4 sm:$0xff]   ;;  %v2860_v28 = vld [vmem:[#allocation4 + $0x20] ss:$8 sps:$4 sm:$0xff]  }
 0x201   :  { %1219 = vmatpush1.bf16.msra.mxu0 %v2776_v29  ;;  %1305 = vmatpush1.bf16.msra.mxu1 %v2779_v30  ;;  %v2865_v29 = vld [vmem:[#allocation4 + $0x34] ss:$8 sps:$4 sm:$0xff]   ;;  %v2863_v30 = vld [vmem:[#allocation4 + $0x30] ss:$8 sps:$4 sm:$0xff]  }
 0x202   :  { %1220 = vmatprep.subr.bf16.mxu0 %v2784_v31  ;;  %1306 = vmatprep.subr.bf16.mxu1 %v2787_v32  ;;  %v2868_v31 = vld [vmem:[#allocation4 + $0x44] ss:$8 sps:$4 sm:$0xff]   ;;  %v2866_v32 = vld [vmem:[#allocation4 + $0x40] ss:$8 sps:$4 sm:$0xff]  }
 0x205   :  { %1221 = vmatpush1.bf16.msra.mxu0 %v2782_v33  ;;  %1307 = vmatpush1.bf16.msra.mxu1 %v2785_v34  ;;  %v2871_v33 = vld [vmem:[#allocation4 + $0x54] ss:$8 sps:$4 sm:$0xff]   ;;  %v2869_v34 = vld [vmem:[#allocation4 + $0x50] ss:$8 sps:$4 sm:$0xff]  }
 0x206   :  { %1222 = vmatprep.subr.bf16.mxu0 %v2790_v35  ;;  %1308 = vmatprep.subr.bf16.mxu1 %v2793_v36  ;;  %v2874_v35 = vld [vmem:[#allocation4 + $0x64] ss:$8 sps:$4 sm:$0xff]   ;;  %v2872_v36 = vld [vmem:[#allocation4 + $0x60] ss:$8 sps:$4 sm:$0xff]  }
 0x209   :  { %1223 = vmatpush1.bf16.msra.mxu0 %v2788_v51  ;;  %1309 = vmatpush1.bf16.msra.mxu1 %v2791_v37  ;;  %v101_v51 = vld [vmem:[#allocation9 + $0x3] ss:$8 sm:$0xf] }
 0x20a   :  { %1224 = vmatprep.subr.bf16.mxu0 %v2796_v52  ;;  %1310 = vmatprep.subr.bf16.mxu1 %v2799_v63  ;;  %v512_v37 = vrot.slane %v101_v51, %v3242_v41  ;;  %v520_v52 = vrot.slane %v101_v51, %v3248_v48  ;;  %v516_v63 = vrot.slane %v101_v51, %v3244_v42 }
 0x20d   :  { %1225 = vmatpush1.bf16.msra.mxu0 %v2794_v38  ;;  %1311 = vmatpush1.bf16.msra.mxu1 %v2797_v39 }
 0x20e   :  { %1226 = vmatprep.subr.bf16.mxu0 %v2802_v40  ;;  %1312 = vmatprep.subr.bf16.mxu1 %v2805_v3 }
 0x211   :  { %1227 = vmatpush1.bf16.msra.mxu0 %v2800_v43  ;;  %1313 = vmatpush1.bf16.msra.mxu1 %v2803_v44  ;;  %v524_v44 = vrot.slane %v101_v51, %v3250_v50  ;;  %v2896_v51 = vld [vmem:[#allocation4 + $0xe0] ss:$8 sps:$4 sm:$0xff]  }
 0x212   :  { %1228 = vmatprep.subr.bf16.mxu0 %v2808_v45  ;;  %1314 = vmatprep.subr.bf16.mxu1 %v2811_v46 }
 0x215   :  { %1229 = vmatpush1.bf16.msra.mxu0 %v2806_v47  ;;  %1315 = vmatpush1.bf16.msra.mxu1 %v2809_v54 }
 0x216   :  { %1230 = vmatprep.subr.bf16.mxu0 %v2814_v49  ;;  %1316 = vmatprep.subr.bf16.mxu1 %v2817_v53 }
 0x219   :  { %1231 = vmatpush1.bf16.msra.mxu0 %v2812_v56  ;;  %1317 = vmatpush1.bf16.msra.mxu1 %v2815_v57 }
 0x21a   :  { %1232 = vmatprep.subr.bf16.mxu0 %v2820_v58  ;;  %1318 = vmatprep.subr.bf16.mxu1 %v2823_v59 }
 0x21d   :  { %1233 = vmatpush1.bf16.msra.mxu0 %v2818_v55  ;;  %1319 = vmatpush1.bf16.msra.mxu1 %v2821_v60 }
 0x21e   :  { %1234 = vmatprep.subr.bf16.mxu0 %v2826_v61  ;;  %1320 = vmatprep.subr.bf16.mxu1 %v2829_v62 }
 0x221   :  { %1235 = vmatpush1.bf16.msra.mxu0 %v2824_v0  ;;  %1321 = vmatpush1.bf16.msra.mxu1 %v2827_v1 }
 0x222   :  { %1236 = vmatprep.subr.bf16.mxu0 %v2832_v5  ;;  %1322 = vmatprep.subr.bf16.mxu1 %v2835_v2 }
 0x225   :  { %1237 = vmatpush1.bf16.msra.mxu0 %v2830_v10  ;;  %1323 = vmatpush1.bf16.msra.mxu1 %v2833_v4 }
 0x226   :  { %1238 = vmatprep.subr.bf16.mxu0 %v2838_v6  ;;  %1324 = vmatprep.subr.bf16.mxu1 %v2841_v7 }
 0x229   :  { %1239 = vmatpush1.bf16.msra.mxu0 %v2836_v8  ;;  %1325 = vmatpush1.bf16.msra.mxu1 %v2839_v9 }
 0x22a   :  { %1240 = vmatprep.subr.bf16.mxu0 %v2844_v11  ;;  %1326 = vmatprep.subr.bf16.mxu1 %v2847_v13 }
 0x22d   :  { %1241 = vmatpush1.bf16.msra.mxu0 %v2842_v14  ;;  %1327 = vmatpush1.bf16.msra.mxu1 %v2845_v16 }
 0x22e   :  { %1242 = vmatprep.subr.bf16.mxu0 %v2850_v18  ;;  %1328 = vmatprep.subr.bf16.mxu1 %v2853_v19 }
 0x231   :  { %1243 = vmatpush1.bf16.msra.mxu0 %v2848_v21  ;;  %1329 = vmatpush1.bf16.msra.mxu1 %v2851_v22  ;;  %v2877_v22 = vld [vmem:[#allocation4 + $0x74] ss:$8 sps:$4 sm:$0xff]  }
 0x232   :  { %1880 = vmatprep.subr.bf16.mxu0 %v2856_v24  ;;  %v2880_v24 = vld [vmem:[#allocation4 + $0x84] ss:$8 sps:$4 sm:$0xff]  }
 0x234   :  { %1245 = vmatmul.mubr.bf16.vlgmr.msra.gmra.mrb[0].mxu0 %v3314_v17  ;;  %1331 = vmatmul.mubr.bf16.vlgmr.msra.gmra.mrb[8].mxu1 %v3314_v17 }
 0x235   :  { %1881 = vmatpush1.bf16.msra.mxu0 %v2854_v23  ;;  %v2875_v23 = vld [vmem:[#allocation4 + $0x70] ss:$8 sps:$4 sm:$0xff]  }
 0x236   :  { %1882 = vmatprep.subr.bf16.mxu0 %v2859_v25  ;;  %v2878_v25 = vld [vmem:[#allocation4 + $0x80] ss:$8 sps:$4 sm:$0xff]  }
 0x239   :  { %1883 = vmatpush1.bf16.msra.mxu0 %v2857_v26  ;;  %v2883_v26 = vld [vmem:[#allocation4 + $0x94] ss:$8 sps:$4 sm:$0xff]  }
 0x23a   :  { %1884 = vmatprep.subr.bf16.mxu0 %v2862_v27  ;;  %v2881_v27 = vld [vmem:[#allocation4 + $0x90] ss:$8 sps:$4 sm:$0xff]  }
 0x23d   :  { %1885 = vmatpush1.bf16.msra.mxu0 %v2860_v28  ;;  %v2886_v28 = vld [vmem:[#allocation4 + $0xa4] ss:$8 sps:$4 sm:$0xff]  }
 0x23e   :  { %1886 = vmatprep.subr.bf16.mxu0 %v2865_v29  ;;  %v2884_v29 = vld [vmem:[#allocation4 + $0xa0] ss:$8 sps:$4 sm:$0xff]  }
 0x241   :  { %1887 = vmatpush1.bf16.msra.mxu0 %v2863_v30  ;;  %v2889_v30 = vld [vmem:[#allocation4 + $0xb4] ss:$8 sps:$4 sm:$0xff]  }
 0x242   :  { %1888 = vmatprep.subr.bf16.mxu0 %v2868_v31  ;;  %v2887_v31 = vld [vmem:[#allocation4 + $0xb0] ss:$8 sps:$4 sm:$0xff]  }
 0x245   :  { %1889 = vmatpush1.bf16.msra.mxu0 %v2866_v32  ;;  %v2892_v32 = vld [vmem:[#allocation4 + $0xc4] ss:$8 sps:$4 sm:$0xff]  }
 0x246   :  { %1890 = vmatprep.subr.bf16.mxu0 %v2871_v33  ;;  %v2890_v33 = vld [vmem:[#allocation4 + $0xc0] ss:$8 sps:$4 sm:$0xff]  }
 0x249   :  { %1891 = vmatpush1.bf16.msra.mxu0 %v2869_v34  ;;  %v2895_v34 = vld [vmem:[#allocation4 + $0xd4] ss:$8 sps:$4 sm:$0xff]  }
 0x24a   :  { %1892 = vmatprep.subr.bf16.mxu0 %v2874_v35  ;;  %v2893_v35 = vld [vmem:[#allocation4 + $0xd0] ss:$8 sps:$4 sm:$0xff]  }
 0x24d   :  { %1893 = vmatpush1.bf16.msra.mxu0 %v2872_v36  ;;  %v2898_v36 = vld [vmem:[#allocation4 + $0xe4] ss:$8 sps:$4 sm:$0xff]  }
 0x24e   :  { %1894 = vmatprep.subr.bf16.mxu0 %v2877_v22 }
 0x251   :  { %1895 = vmatpush1.bf16.msra.mxu0 %v2875_v23 }
 0x252   :  { %1896 = vmatprep.subr.bf16.mxu0 %v2880_v24 }
 0x255   :  { %1897 = vmatpush1.bf16.msra.mxu0 %v2878_v25 }
 0x256   :  { %1898 = vmatprep.subr.bf16.mxu0 %v2883_v26 }
 0x259   :  { %1899 = vmatpush1.bf16.msra.mxu0 %v2881_v27 }
 0x25a   :  { %1900 = vmatprep.subr.bf16.mxu0 %v2886_v28 }
 0x25d   :  { %1901 = vmatpush1.bf16.msra.mxu0 %v2884_v29 }
 0x25e   :  { %1902 = vmatprep.subr.bf16.mxu0 %v2889_v30 }
 0x261   :  { %1903 = vmatpush1.bf16.msra.mxu0 %v2887_v31 }
 0x262   :  { %1904 = vmatprep.subr.bf16.mxu0 %v2892_v32 }
 0x265   :  { %1905 = vmatpush1.bf16.msra.mxu0 %v2890_v33 }
 0x266   :  { %1906 = vmatprep.subr.bf16.mxu0 %v2895_v34 }
 0x269   :  { %1907 = vmatpush1.bf16.msra.mxu0 %v2893_v35 }
 0x26a   :  { %1908 = vmatprep.subr.bf16.mxu0 %v2898_v36 }
 0x26d   :  { %1909 = vmatpush1.bf16.msra.mxu0 %v2896_v51 }
 0x307   :  { %v1246_v38 = vpop.f32.mrb[0].mxu0  ;;  %v1332_v39 = vpop.f32.mrb[8].mxu1 }
 0x308   :  { %v3329_v40 = vadd.f32 %v1246_v38, %v512_v37  ;;  %v3331_v3 = vadd.f32 %v1332_v39, %v520_v52  ;;  %v1248_v43 = vpop.f32.mrb[1].mxu0  ;;  %v1334_v45 = vpop.f32.mrb[9].mxu1 }
 0x309   :  { %v3334_v46 = vadd.f32 %v1248_v43, %v516_v63  ;;  %v1250_v47 = vpop.f32.mrb[2].mxu0  ;;  %v1336_v54 = vpop.f32.mrb[10].mxu1  ;;  %v3350_v62 = vadd.f32 %v1334_v45, %v524_v44 }
 0x30a   :  { %v1351_v49 = vmul.f32 %v3329_v40, %v3329_v40  ;;  %v3338_v53 = vadd.f32 %v1250_v47, %v512_v37  ;;  %v3340_v56 = vadd.f32 %v1336_v54, %v520_v52  ;;  %v1252_v57 = vpop.f32.mrb[3].mxu0  ;;  %v1338_v58 = vpop.f32.mrb[11].mxu1  ;;  %v1353_v61 = vmul.f32 %v3331_v3, %v3331_v3  ;;  %v2901_v37 = vld [vmem:[#allocation4 + $0xf4] ss:$8 sps:$4 sm:$0xff]   ;;  %v2899_v52 = vld [vmem:[#allocation4 + $0xf0] ss:$8 sps:$4 sm:$0xff]  }
 0x30b   :  { %v1341_v59 = vadd.f32 %v3334_v46, %v3329_v40  ;;  %v1352_v55 = vmul.f32 %v3334_v46, %v3334_v46  ;;  %v3346_v60 = vadd.f32 %v1252_v57, %v516_v63  ;;  %v3361_v6 = vadd.f32 %v1338_v58, %v524_v44  ;;  %1910 = vmatprep.subr.bf16.mxu0 %v2901_v37  ;;  %v2904_v63 = vld [vmem:[#allocation4 + $0x104] ss:$8 sps:$4 sm:$0xff]  }
 0x30c   :  { %v1355_v0 = vmul.f32 %v3338_v53, %v3338_v53  ;;  %v1357_v4 = vmul.f32 %v3340_v56, %v3340_v56  ;;  %v1354_v14 = vmul.f32 %v3350_v62, %v3350_v62  ;;  %1911 = vmatpush1.bf16.msra.mxu0 %v2899_v52 }
 0x30d   :  { %v1342_v1 = vadd.f32 %v3346_v60, %v3338_v53  ;;  %v1356_v5 = vmul.f32 %v3346_v60, %v3346_v60  ;;  %v1343_v2 = vadd.f32 %v3331_v3, %v1341_v59  ;;  %v1359_v10 = vadd.f32 %v1352_v55, %v1351_v49  ;;  %1923 = vmatprep.subr.bf16.mxu0 %v2904_v63 }
 0x30e   :  { %v1358_v19 = vmul.f32 %v3361_v6, %v3361_v6 }
 0x30f   :  { %v1345_v7 = vadd.f32 %v3350_v62, %v1343_v2  ;;  %v1344_v8 = vadd.f32 %v3340_v56, %v1342_v1  ;;  %v1361_v9 = vadd.f32 %v1359_v10, %v1353_v61  ;;  %v1360_v11 = vadd.f32 %v1356_v5, %v1355_v0  ;;  %v103_v2 = vld [vmem:[#allocation9 + $0x4] ss:$8 sm:$0xf] }
 0x310   :  { %v1466_v10 = vunpack.c.l.bf16 %v3310_v12 }
 0x311   :  { %1347 = vadd.xlane.f32.xlu0 %v1345_v7  ;;  %v1346_v13 = vadd.f32 %v3361_v6, %v1344_v8  ;;  %v1362_v16 = vadd.f32 %v1360_v11, %v1357_v4  ;;  %v1363_v18 = vadd.f32 %v1361_v9, %v1354_v14  ;;  %v105_v4 = vld [vmem:[#allocation9 + $0x5] ss:$8 sm:$0xf]  ;;  %v1470_v7 = vunpack.c.h.bf16 %v3310_v12 }
 0x312   :  { %v1465_v8 = vunpack.c.l.bf16 %v3312_v15  ;;  %v1469_v9 = vunpack.c.h.bf16 %v3312_v15  ;;  %v1468_v11 = vunpack.c.l.bf16 %v3320_v20  ;;  %v1403_v14 = vrot.slane %v103_v2, %v3242_v41 }
 0x313   :  { %1349 = vadd.xlane.f32.xlu1 %v1346_v13  ;;  %v1364_v21 = vadd.f32 %v1362_v16, %v1358_v19  ;;  %v1407_v13 = vrot.slane %v103_v2, %v3244_v42  ;;  %v1415_v16 = vrot.slane %v103_v2, %v3250_v50  ;;  %v1436_v25 = vrot.slane %v105_v4, %v3244_v42 }
 0x314   :  { %v1432_v26 = vrot.slane %v105_v4, %v3242_v41  ;;  %v1440_v31 = vrot.slane %v105_v4, %v3248_v48 }
 0x315   :  { %1365 = vadd.xlane.f32.xlu0 %v1363_v18  ;;  %v1411_v18 = vrot.slane %v103_v2, %v3248_v48 }
 0x317   :  { %1367 = vadd.xlane.f32.xlu1 %v1364_v21 }
 0x39e   :  { %v1348_v38 = vpop.xlane.xlu0 %1347 }
 0x39f   :  { %v1369_v39 = vmul.f32 0.001953125, %v1348_v38 }
 0x3a0   :  { %v1350_v43 = vpop.xlane.xlu1 %1349 }
 0x3a1   :  { %v1370_v44 = vmul.f32 0.001953125, %v1350_v43  ;;  %v1373_v47 = vmul.f32 %v1369_v39, %v1369_v39  ;;  %v1379_v19 = vsub.f32 %v3329_v40, %v1369_v39  ;;  %v1380_v21 = vsub.f32 %v3334_v46, %v1369_v39 }
 0x3a2   :  { %v1366_v45 = vpop.xlane.xlu0 %1365  ;;  %v1381_v12 = vsub.f32 %v3331_v3, %v1369_v39  ;;  %v1382_v22 = vsub.f32 %v3350_v62, %v1369_v39  ;;  %v1444_v62 = vrot.slane %v105_v4, %v3250_v50 }
 0x3a3   :  { %v1371_v54 = vmul.f32 0.001953125, %v1366_v45  ;;  %v1374_v58 = vmul.f32 %v1370_v44, %v1370_v44  ;;  %v1383_v15 = vsub.f32 %v3338_v53, %v1370_v44  ;;  %v1384_v24 = vsub.f32 %v3346_v60, %v1370_v44 }
 0x3a4   :  { %v1368_v49 = vpop.xlane.xlu1 %1367  ;;  %v1385_v46 = vsub.f32 %v3340_v56, %v1370_v44  ;;  %v1386_v3 = vsub.f32 %v3361_v6, %v1370_v44 }
 0x3a5   :  { %v1375_v57 = vsub.f32 %v1371_v54, %v1373_v47  ;;  %v1372_v59 = vmul.f32 0.001953125, %v1368_v49 }
 0x3a7   :  { %v1377_v55 = vmax.f32 %v1375_v57, 0.0  ;;  %v1376_v61 = vsub.f32 %v1372_v59, %v1374_v58  ;;  %v1467_v57 = vunpack.c.l.bf16 %v3314_v17 }
 0x3a9   :  { %v1387_v0 = vadd.f32 1e-05, %v1377_v55  ;;  %v1378_v1 = vmax.f32 %v1376_v61, 0.0  ;;  %v1472_v61 = vunpack.c.h.bf16 %v3320_v20  ;;  %v2916_v20 = vld [vmem:[#allocation4 + $0x144] ss:$8 sps:$4 sm:$0xff]  }
 0x3ab   :  { %2978 = vrsqrt.f32 %v1387_v0  ;;  %v1388_v5 = vadd.f32 1e-05, %v1378_v1 }
 0x3ad   :  { %2980 = vrsqrt.f32 %v1388_v5  ;;  %v1471_v5 = vunpack.c.h.bf16 %v3314_v17 }
 0x3b5   :  { %v2979_v23 = vpop.eup %2978 }
 0x3b6   :  { %v1392_v27 = vmul.f32 %v2979_v23, %v1380_v21  ;;  %v1391_v28 = vmul.f32 %v2979_v23, %v1379_v19  ;;  %v1394_v29 = vmul.f32 %v2979_v23, %v1382_v22  ;;  %v1393_v30 = vmul.f32 %v2979_v23, %v1381_v12  ;;  %v2902_v12 = vld [vmem:[#allocation4 + $0x100] ss:$8 sps:$4 sm:$0xff]  }
 0x3b7   :  { %v2981_v40 = vpop.eup %2980 }
 0x3b8   :  { %v1396_v53 = vmul.f32 %v2981_v40, %v1384_v24  ;;  %v1421_v32 = vmul.f32 %v1407_v13, %v1392_v27  ;;  %v1395_v60 = vmul.f32 %v2981_v40, %v1383_v15  ;;  %v1420_v33 = vmul.f32 %v1403_v14, %v1391_v28  ;;  %v2907_v15 = vld [vmem:[#allocation4 + $0x114] ss:$8 sps:$4 sm:$0xff]   ;;  %v2917_v27 = vld [vmem:[#allocation4 + $0x150] ss:$8 sps:$4 sm:$0xff]   ;;  %v2922_v28 = vld [vmem:[#allocation4 + $0x164] ss:$8 sps:$4 sm:$0xff]  }
 0x3b9   :  { %v1398_v34 = vmul.f32 %v2981_v40, %v1386_v3  ;;  %v1423_v35 = vmul.f32 %v1415_v16, %v1394_v29  ;;  %v1397_v36 = vmul.f32 %v2981_v40, %v1385_v46  ;;  %v1422_v51 = vmul.f32 %v1411_v18, %v1393_v30  ;;  %v2920_v29 = vld [vmem:[#allocation4 + $0x160] ss:$8 sps:$4 sm:$0xff]   ;;  %v2925_v30 = vld [vmem:[#allocation4 + $0x174] ss:$8 sps:$4 sm:$0xff]   ;;  %v2923_v40 = vld [vmem:[#allocation4 + $0x170] ss:$8 sps:$4 sm:$0xff]  }
 0x3ba   :  { %v1425_v37 = vmul.f32 %v1407_v13, %v1396_v53  ;;  %v1450_v52 = vadd.f32 %v1436_v25, %v1421_v32  ;;  %v1424_v63 = vmul.f32 %v1403_v14, %v1395_v60  ;;  %v1449_v38 = vadd.f32 %v1432_v26, %v1420_v33  ;;  %v2928_v46 = vld [vmem:[#allocation4 + $0x184] ss:$8 sps:$4 sm:$0xff]   ;;  %v2926_v3 = vld [vmem:[#allocation4 + $0x180] ss:$8 sps:$4 sm:$0xff]   ;;  %v2937_v60 = vld [vmem:[#allocation4 + $0x1b4] ss:$8 sps:$4 sm:$0xff]  }
 0x3bb   :  { %v1427_v39 = vmul.f32 %v1415_v16, %v1398_v34  ;;  %v1452_v56 = vadd.f32 %v1444_v62, %v1423_v35  ;;  %v1426_v43 = vmul.f32 %v1411_v18, %v1397_v36  ;;  %v1451_v6 = vadd.f32 %v1440_v31, %v1422_v51  ;;  %v2934_v53 = vld [vmem:[#allocation4 + $0x1a4] ss:$8 sps:$4 sm:$0xff]   ;;  %v2932_v32 = vld [vmem:[#allocation4 + $0x1a0] ss:$8 sps:$4 sm:$0xff]   ;;  %v2935_v33 = vld [vmem:[#allocation4 + $0x1b0] ss:$8 sps:$4 sm:$0xff]  }
 0x3bc   :  { %v1454_v44 = vadd.f32 %v1436_v25, %v1425_v37  ;;  %v1458_v50 = vmax.f32 %v1450_v52, 0.0  ;;  %v1453_v45 = vadd.f32 %v1432_v26, %v1424_v63  ;;  %v1457_v48 = vmax.f32 %v1449_v38, 0.0  ;;  %v2911_v25 = vld [vmem:[#allocation4 + $0x130] ss:$8 sps:$4 sm:$0xff]   ;;  %v2919_v26 = vld [vmem:[#allocation4 + $0x154] ss:$8 sps:$4 sm:$0xff]  }
 0x3bd   :  { %v1456_v47 = vadd.f32 %v1444_v62, %v1427_v39  ;;  %v1455_v54 = vadd.f32 %v1440_v31, %v1426_v43  ;;  %v1459_v49 = vmax.f32 %v1451_v6, 0.0  ;;  %v1460_v55 = vmax.f32 %v1452_v56, 0.0  ;;  %v2931_v62 = vld [vmem:[#allocation4 + $0x194] ss:$8 sps:$4 sm:$0xff]   ;;  %v2929_v31 = vld [vmem:[#allocation4 + $0x190] ss:$8 sps:$4 sm:$0xff]  }
 0x3be   :  { %v1462_v58 = vmax.f32 %v1454_v44, 0.0  ;;  %v1461_v59 = vmax.f32 %v1453_v45, 0.0  ;;  %v1474_v4 = vadd.f32 %v1466_v10, %v1458_v50  ;;  %v1473_v14 = vadd.f32 %v1465_v8, %v1457_v48  ;;  %v2905_v10 = vld [vmem:[#allocation4 + $0x110] ss:$8 sps:$4 sm:$0xff]   ;;  %v2908_v8 = vld [vmem:[#allocation4 + $0x120] ss:$8 sps:$4 sm:$0xff]  }
 0x3bf   :  { %v1464_v0 = vmax.f32 %v1456_v47, 0.0  ;;  %v1463_v1 = vmax.f32 %v1455_v54, 0.0  ;;  %v3394_v2 = vadd.f32 %v1467_v57, %v1459_v49  ;;  %v1476_v23 = vadd.f32 %v1468_v11, %v1460_v55  ;;  %v2914_v11 = vld [vmem:[#allocation4 + $0x140] ss:$8 sps:$4 sm:$0xff]   ;;  %v2940_v34 = vld [vmem:[#allocation4 + $0x1c4] ss:$8 sps:$4 sm:$0xff]  }
 0x3c0   :  { %v1478_v13 = vadd.f32 %v1470_v7, %v1462_v58  ;;  %v1477_v16 = vadd.f32 %v1469_v9, %v1461_v59  ;;  %v2910_v7 = vld [vmem:[#allocation4 + $0x124] ss:$8 sps:$4 sm:$0xff]   ;;  %v2913_v9 = vld [vmem:[#allocation4 + $0x134] ss:$8 sps:$4 sm:$0xff]   ;;  %v2938_v35 = vld [vmem:[#allocation4 + $0x1c0] ss:$8 sps:$4 sm:$0xff]  }
 0x3c1   :  { %v1480_v18 = vadd.f32 %v1472_v61, %v1464_v0  ;;  %v3396_v19 = vadd.f32 %v1471_v5, %v1463_v1  ;;  %v2943_v36 = vld [vmem:[#allocation4 + $0x1d4] ss:$8 sps:$4 sm:$0xff]   ;;  %v2941_v51 = vld [vmem:[#allocation4 + $0x1d0] ss:$8 sps:$4 sm:$0xff]   ;;  %v2946_v37 = vld [vmem:[#allocation4 + $0x1e4] ss:$8 sps:$4 sm:$0xff]  }
 0x3c2   :  { %v1482_v21 = vpack.c.bf16 %v1478_v13, %v1474_v4  ;;  %v1481_v22 = vpack.c.bf16 %v1477_v16, %v1473_v14  ;;  %v2944_v52 = vld [vmem:[#allocation4 + $0x1e0] ss:$8 sps:$4 sm:$0xff]   ;;  %v2949_v63 = vld [vmem:[#allocation4 + $0x1f4] ss:$8 sps:$4 sm:$0xff]   ;;  %v2947_v38 = vld [vmem:[#allocation4 + $0x1f0] ss:$8 sps:$4 sm:$0xff]  }
 0x3c3   :  { %v1483_v24 = vpack.c.bf16 %v3396_v19, %v3394_v2  ;;  %v1484_v17 = vpack.c.bf16 %v1480_v18, %v1476_v23  ;;  %v107_v39 = vld [vmem:[#allocation9 + $0x6] ss:$8 sm:$0x3]  ;;  %v2954_v16 = vld [vmem:[#allocation6 + $0x50] sm:$0xff]   ;;  %v2956_v19 = vld [vmem:[#allocation6 + $0x58] sm:$0xff]  }
 0x3c4   :  { %1912 = vmatprep.mubr.bf16.mxu0 %v1482_v21  ;;  %v1553_v56 = vrot.slane %v107_v39, %v3242_v41  ;;  %v1557_v43 = vrot.slane %v107_v39, %v3244_v42  ;;  %v2950_v2 = vld [vmem:[#allocation6 + $0x40] sm:$0xff]   ;;  %v2952_v13 = vld [vmem:[#allocation6 + $0x48] sm:$0xff]   ;;  %v2955_v18 = vld [vmem:[#allocation6 + $0x10] sm:$0xff]  }
 0x3c5   :  { %1913 = vmatmul.mubr.bf16.vlgmr.msra.gmra.mrb[4].mxu0 %v1481_v22  ;;  %v2951_v4 = vld [vmem:[#allocation6] sm:$0xff]   ;;  %2565 = vmatprep.subr.bf16.mxu1 %v2950_v2  ;;  %v2953_v14 = vld [vmem:[#allocation6 + $0x8] sm:$0xff]   ;;  %v2957_v21 = vld [vmem:[#allocation6 + $0x18] sm:$0xff]  }
 0x3c6   :  { %1924 = vmatpush1.bf16.msra.mxu0 %v2902_v12  ;;  %1955 = vmatprep.mubr.bf16.mxu0 %v1484_v17  ;;  %v2958_v12 = vld [vmem:[#allocation6 + $0x60] sm:$0xff]   ;;  %v2960_v23 = vld [vmem:[#allocation6 + $0x68] sm:$0xff]   ;;  %v2963_v17 = vld [vmem:[#allocation6 + $0x30] sm:$0xff]  }
 0x3c7   :  { %1925 = vmatprep.subr.bf16.mxu0 %v2907_v15  ;;  %2566 = vmatpush3.bf16.msra.mxu1 %v2951_v4  ;;  %v2959_v22 = vld [vmem:[#allocation6 + $0x20] sm:$0xff]   ;;  %v2961_v15 = vld [vmem:[#allocation6 + $0x28] sm:$0xff]   ;;  %v2968_v4 = vld [vmem:[#allocation7 + $0x10] sm:$0xff]  }
 0x3c8   :  { %2567 = vmatprep.subr.bf16.mxu1 %v2952_v13  ;;  %v2967_v2 = vld [vmem:[#allocation7 + $0x8] sm:$0xff]   ;;  %v2969_v13 = vld [vmem:[#allocation7 + $0x18] sm:$0xff]  }
 0x3ca   :  { %1926 = vmatpush1.bf16.msra.mxu0 %v2905_v10  ;;  %v2964_v10 = vld [vmem:[#allocation6 + $0x78] sm:$0xff]  }
 0x3cb   :  { %1927 = vmatprep.subr.bf16.mxu0 %v2910_v7  ;;  %2568 = vmatpush3.bf16.msra.mxu1 %v2953_v14  ;;  %v2965_v7 = vld [vmem:[#allocation6 + $0x38] sm:$0xff]   ;;  %v2970_v14 = vld [vmem:[#allocation7 + $0x20] sm:$0xff]  }
 0x3cc   :  { %2569 = vmatprep.subr.bf16.mxu1 %v2954_v16  ;;  %v2971_v16 = vld [vmem:[#allocation7 + $0x28] sm:$0xff]  }
 0x3ce   :  { %1928 = vmatpush1.bf16.msra.mxu0 %v2908_v8  ;;  %v3116_v8 = vmov 0.0  }
 0x3cf   :  { %1929 = vmatprep.subr.bf16.mxu0 %v2913_v9  ;;  %2570 = vmatpush3.bf16.msra.mxu1 %v2955_v18  ;;  %v2972_v18 = vld [vmem:[#allocation7 + $0x30] sm:$0xff]  }
 0x3d0   :  { %2571 = vmatprep.subr.bf16.mxu1 %v2956_v19  ;;  %v2973_v19 = vld [vmem:[#allocation7 + $0x38] sm:$0xff]  }
 0x3d2   :  { %1930 = vmatpush1.bf16.msra.mxu0 %v2911_v25 }
 0x3d3   :  { %1931 = vmatprep.subr.bf16.mxu0 %v2916_v20  ;;  %2572 = vmatpush3.bf16.msra.mxu1 %v2957_v21 }
 0x3d4   :  { %2573 = vmatprep.subr.bf16.mxu1 %v2958_v12  ;;  %v112_v12 = vld [vmem:[#allocation9 + $0x21] ss:$0 sm:$0xff] }
 0x3d6   :  { %1932 = vmatpush1.bf16.msra.mxu0 %v2914_v11 }
 0x3d7   :  { %1933 = vmatprep.subr.bf16.mxu0 %v2919_v26  ;;  %2574 = vmatpush3.bf16.msra.mxu1 %v2959_v22 }
 0x3d8   :  { %2575 = vmatprep.subr.bf16.mxu1 %v2960_v23 }
 0x3da   :  { %1934 = vmatpush1.bf16.msra.mxu0 %v2917_v27 }
 0x3db   :  { %1935 = vmatprep.subr.bf16.mxu0 %v2922_v28  ;;  %2576 = vmatpush3.bf16.msra.mxu1 %v2961_v15 }
 0x3de   :  { %1936 = vmatpush1.bf16.msra.mxu0 %v2920_v29 }
 0x3df   :  { %1937 = vmatprep.subr.bf16.mxu0 %v2925_v30 }
 0x3e2   :  { %1938 = vmatpush1.bf16.msra.mxu0 %v2923_v40 }
 0x3e3   :  { %1939 = vmatprep.subr.bf16.mxu0 %v2928_v46 }
 0x3e6   :  { %1940 = vmatpush1.bf16.msra.mxu0 %v2926_v3 }
 0x3e7   :  { %1941 = vmatprep.subr.bf16.mxu0 %v2931_v62 }
 0x3ea   :  { %1942 = vmatpush1.bf16.msra.mxu0 %v2929_v31 }
 0x3eb   :  { %1943 = vmatprep.subr.bf16.mxu0 %v2934_v53 }
 0x3ee   :  { %1944 = vmatpush1.bf16.msra.mxu0 %v2932_v32 }
 0x3ef   :  { %1945 = vmatprep.subr.bf16.mxu0 %v2937_v60  ;;  %v109_v60 = vld [vmem:[#allocation9 + $0x7] ss:$8 sm:$0x3] }
 0x3f2   :  { %1946 = vmatpush1.bf16.msra.mxu0 %v2935_v33  ;;  %v111_v33 = vld [vmem:[#allocation9 + $0x20] ss:$8 sm:$0x3] }
 0x3f3   :  { %1947 = vmatprep.subr.bf16.mxu0 %v2940_v34 }
 0x3f6   :  { %1948 = vmatpush1.bf16.msra.mxu0 %v2938_v35 }
 0x3f7   :  { %1949 = vmatprep.subr.bf16.mxu0 %v2943_v36  ;;  %v2008_v36 = vrot.slane %v109_v60, %v3242_v41 }
 0x3fa   :  { %1950 = vmatpush1.bf16.msra.mxu0 %v2941_v51  ;;  %v2012_v51 = vrot.slane %v109_v60, %v3244_v42 }
 0x3fb   :  { %1951 = vmatprep.subr.bf16.mxu0 %v2946_v37 }
 0x3fe   :  { %1952 = vmatpush1.bf16.msra.mxu0 %v2944_v52  ;;  %v2023_v52 = vrot.slane %v111_v33, %v3242_v41 }
 0x3ff   :  { %1953 = vmatprep.subr.bf16.mxu0 %v2949_v63  ;;  %v2027_v63 = vrot.slane %v111_v33, %v3244_v42 }
 0x402   :  { %1954 = vmatpush1.bf16.msra.mxu0 %v2947_v38 }
 0x405   :  { %1956 = vmatmul.mubr.bf16.vlgmr.msra.gmra.mrb[4].mxu0 %v1483_v24  ;;  %v2962_v24 = vld [vmem:[#allocation6 + $0x70] sm:$0xff]  }
 0x406   :  { %2577 = vmatprep.subr.bf16.mxu1 %v2962_v24 }
 0x407   :  { %2578 = vmatpush3.bf16.msra.mxu1 %v2963_v17 }
 0x408   :  { %2579 = vmatprep.subr.bf16.mxu1 %v2964_v10 }
 0x40b   :  { %2580 = vmatpush3.bf16.msra.mxu1 %v2965_v7 }
 0x40c   :  { %2596 = vmatprep.subr.bf16.mxu1 %v3116_v8 }
 0x4d8   :  { %v1957_v6 = vpop.f32.mrb[4].mxu0 }
 0x4d9   :  { %v3407_v44 = vadd.f32 %v1957_v6, %v1553_v56  ;;  %v1959_v50 = vpop.f32.mrb[5].mxu0 }
 0x4da   :  { %v3409_v45 = vadd.f32 %v1959_v50, %v1557_v43  ;;  %v1961_v48 = vpop.f32.mrb[6].mxu0 }
 0x4db   :  { %v3411_v47 = vadd.f32 %v1961_v48, %v1553_v56  ;;  %v1963_v54 = vpop.f32.mrb[7].mxu0  ;;  %v1972_v58 = vmul.f32 %v3407_v44, %v3407_v44 }
 0x4dc   :  { %v3413_v49 = vadd.f32 %v1963_v54, %v1557_v43  ;;  %v1966_v57 = vadd.f32 %v3409_v45, %v3407_v44  ;;  %v1973_v59 = vmul.f32 %v3409_v45, %v3409_v45 }
 0x4dd   :  { %v1974_v61 = vmul.f32 %v3411_v47, %v3411_v47 }
 0x4de   :  { %1968 = vadd.xlane.f32.xlu0 %v1966_v57  ;;  %v1967_v55 = vadd.f32 %v3413_v49, %v3411_v47  ;;  %v1975_v0 = vmul.f32 %v3413_v49, %v3413_v49  ;;  %v1976_v1 = vadd.f32 %v1973_v59, %v1972_v58 }
 0x4e0   :  { %1970 = vadd.xlane.f32.xlu1 %v1967_v55  ;;  %v1977_v5 = vadd.f32 %v1975_v0, %v1974_v61 }
 0x4e2   :  { %1978 = vadd.xlane.f32.xlu0 %v1976_v1 }
 0x4e4   :  { %1980 = vadd.xlane.f32.xlu1 %v1977_v5 }
 0x56b   :  { %v1969_v9 = vpop.xlane.xlu0 %1968 }
 0x56c   :  { %v1982_v25 = vmul.f32 0.00390625, %v1969_v9 }
 0x56d   :  { %v1971_v20 = vpop.xlane.xlu1 %1970 }
 0x56e   :  { %v1983_v11 = vmul.f32 0.00390625, %v1971_v20  ;;  %v1986_v27 = vmul.f32 %v1982_v25, %v1982_v25  ;;  %v1992_v34 = vsub.f32 %v3407_v44, %v1982_v25  ;;  %v1993_v35 = vsub.f32 %v3409_v45, %v1982_v25 }
 0x56f   :  { %v1979_v26 = vpop.xlane.xlu0 %1978 }
 0x570   :  { %v1984_v28 = vmul.f32 0.00390625, %v1979_v26  ;;  %v1987_v40 = vmul.f32 %v1983_v11, %v1983_v11  ;;  %v1994_v38 = vsub.f32 %v3411_v47, %v1983_v11  ;;  %v1995_v39 = vsub.f32 %v3413_v49, %v1983_v11  ;;  %v2966_v49 = vld [vmem:[#allocation7] sm:$0xff]  }
 0x571   :  { %v1981_v29 = vpop.xlane.xlu1 %1980  ;;  %v113_v11 = vld [vmem:[#allocation9 + $0x22] ss:$0 sm:$0xff] }
 0x572   :  { %v1988_v30 = vsub.f32 %v1984_v28, %v1986_v27  ;;  %v1985_v46 = vmul.f32 0.00390625, %v1981_v29 }
 0x574   :  { %v1990_v3 = vmax.f32 %v1988_v30, 0.0  ;;  %v1989_v62 = vsub.f32 %v1985_v46, %v1987_v40 }
 0x576   :  { %v1996_v31 = vadd.f32 1e-05, %v1990_v3  ;;  %v1991_v53 = vmax.f32 %v1989_v62, 0.0 }
 0x578   :  { %2982 = vrsqrt.f32 %v1996_v31  ;;  %v1997_v32 = vadd.f32 1e-05, %v1991_v53 }
 0x57a   :  { %2984 = vrsqrt.f32 %v1997_v32 }
 0x582   :  { %v2983_v37 = vpop.eup %2982 }
 0x583   :  { %v2001_v56 = vmul.f32 %v2983_v37, %v1993_v35  ;;  %v2000_v43 = vmul.f32 %v2983_v37, %v1992_v34 }
 0x584   :  { %v2985_v6 = vpop.eup %2984 }
 0x585   :  { %v2003_v50 = vmul.f32 %v2985_v6, %v1995_v39  ;;  %v2016_v44 = vmul.f32 %v2012_v51, %v2001_v56  ;;  %v2002_v48 = vmul.f32 %v2985_v6, %v1994_v38  ;;  %v2015_v45 = vmul.f32 %v2008_v36, %v2000_v43 }
 0x587   :  { %v2018_v54 = vmul.f32 %v2012_v51, %v2003_v50  ;;  %v2031_v57 = vadd.f32 %v2027_v63, %v2016_v44  ;;  %v2017_v58 = vmul.f32 %v2008_v36, %v2002_v48  ;;  %v2030_v59 = vadd.f32 %v2023_v52, %v2015_v45 }
 0x589   :  { %v2033_v55 = vadd.f32 %v2027_v63, %v2018_v54  ;;  %v2032_v61 = vadd.f32 %v2023_v52, %v2017_v58  ;;  %v2035_v41 = vmax.f32 %v2031_v57, 0.0  ;;  %v2034_v42 = vmax.f32 %v2030_v59, 0.0 }
 0x58b   :  { %v2037_v0 = vmax.f32 %v2033_v55, 0.0  ;;  %v2036_v1 = vmax.f32 %v2032_v61, 0.0 }
 0x58d   :  { %v2039_v47 = vpack.c.bf16 %v2037_v0, %v2035_v41  ;;  %v2038_v5 = vpack.c.bf16 %v2036_v1, %v2034_v42 }
 0x58f   :  { %2200 = vmatprep.mubr.bf16.mxu1 %v2039_v47 }
 0x590   :  { %2201 = vmatmul.mubr.bf16.vlgmr.msra.gmra.mrb[12].mxu1 %v2038_v5 }
 0x591   :  { %2597 = vmatpush3.bf16.msra.mxu1 %v2966_v49  ;;  %2612 = vmatprep.mubr.msk.bf16.mxu1 %vm3117_vm1, %v3116_v8 }
 0x592   :  { %2598 = vmatprep.subr.bf16.mxu1 %v3116_v8 }
 0x595   :  { %2599 = vmatpush3.bf16.msra.mxu1 %v2967_v2 }
 0x596   :  { %2600 = vmatprep.subr.bf16.mxu1 %v3116_v8 }
 0x599   :  { %2601 = vmatpush3.bf16.msra.mxu1 %v2968_v4 }
 0x59a   :  { %2602 = vmatprep.subr.bf16.mxu1 %v3116_v8 }
 0x59d   :  { %2603 = vmatpush3.bf16.msra.mxu1 %v2969_v13 }
 0x59e   :  { %2604 = vmatprep.subr.bf16.mxu1 %v3116_v8 }
 0x5a1   :  { %2605 = vmatpush3.bf16.msra.mxu1 %v2970_v14 }
 0x5a2   :  { %2606 = vmatprep.subr.bf16.mxu1 %v3116_v8 }
 0x5a5   :  { %2607 = vmatpush3.bf16.msra.mxu1 %v2971_v16 }
 0x5a6   :  { %2608 = vmatprep.subr.bf16.mxu1 %v3116_v8 }
 0x5a9   :  { %2609 = vmatpush3.bf16.msra.mxu1 %v2972_v18 }
 0x5aa   :  { %2610 = vmatprep.subr.bf16.mxu1 %v3116_v8 }
 0x5ad   :  { %2611 = vmatpush3.bf16.msra.mxu1 %v2973_v19 }
 0x663   :  { %v2581_v21 = vpop.f32.mrb[12].mxu1 }
 0x664   :  { %v2582_v22 = vpop.f32.mrb[13].mxu1 }
 0x665   :  { %v2583_v23 = vadd.f32 %v2582_v22, %v2581_v21  ;;  %v2584_v15 = vpop.f32.mrb[14].mxu1 }
 0x666   :  { %v2585_v24 = vpop.f32.mrb[15].mxu1 }
 0x667   :  { %v2203_v17 = vadd.f32 %v2583_v23, %v112_v12  ;;  %v2586_v10 = vadd.f32 %v2585_v24, %v2584_v15 }
 0x669   :  { %v2206_v7 = vadd.f32 %v2586_v10, %v112_v12  ;;  %v2209_v9 = vmax.f32 %v2203_v17, 0.0 }
 0x66b   :  { %v2210_v25 = vmax.f32 %v2206_v7, 0.0 }
 0x66d   :  { %v2211_v20 = vpack.c.bf16 %v2210_v25, %v2209_v9 }
 0x66f   :  { %2613 = vmatmul.mubr.bf16.vlgmr.msra.gmra.mrb[16].mxu1 %v2211_v20 }
 0x742   :  { %v2310_v26 = vpop.f32.mrb[16].mxu1 }
 0x743   :  { %v2614_v27 = vpop.f32.mrb[17].mxu1  ;;  %v2311_v29 = vadd.f32 %v2310_v26, %v113_v11 }
 0x744   :  { %v2313_v28 = vpop.f32.mrb[18].mxu1 }
 0x745   :  { %v2314_v30 = vadd.f32 %v2313_v28, %v113_v11  ;;  %v2615_v8 = vpop.f32.mrb[19].mxu1 }
 0x747   :  { %v2563_v40 = vpack.c.bf16 %v2314_v30, %v2311_v29 }
 0x749   :  { %2564 = vst [vmem:[%s3454_s7] sm:$0xff] %v2563_v40  }
 0x74a   :  { %2331 = vsyncpa [#allocation3], 1 }
 0x74b   :  { %2332 = vsyncpa [#allocation5], 1 }
 0x74c   :  { %2333 = vsyncpa [#allocation8], 1 }

</bundles_post_ra>
